<compile_context>
chip_gen: v7x
topology: tpu7x:2x2x1
jax: 0.10.0
libtpu: 0.0.40
codegen_flags: <defaults>
</compile_context>

<pallas_src>
import functools

import jax
import jax.numpy as jnp
from jax.experimental import pallas as pl
from jax.experimental.pallas import tpu as pltpu  # noqa: F401  (kept for parity with template)

C_OUT = 50
KH = KW = 3
H, W = 20, 40
HP, WP = H // 2, W // 2          # pooled spatial: 10 x 20
PW = HP * WP                     # 200 pooled positions per channel
SEG = 256                        # lane-aligned segment per (batch, pool-offset); lanes [PW,SEG) are zero
F = C_OUT * PW                   # 10000
N_CLS = 5


def fused_kernel(p_ref, cw_ref, cb_ref, lw_ref, lb_ref, o_ref, *, batch):
    """Single fused conv+maxpool+linear kernel.

    p_ref : (9, batch*4*SEG)  im2col patches; lane = ((b*4 + off)*SEG + s), s = ph*WP + pw
    cw_ref: (50, 9)           conv weight (C_out x taps)
    cb_ref: (50, 1)           conv bias
    lw_ref: (5, 50, 200)      linear weight as a free view of (5, 10000) (torch view order)
    lb_ref: (5, 1)            linear bias (column)
    o_ref : (5, batch)        logits, transposed to (batch, 5) in the wrapper
    """
    # One lane-dense MXU matmul covers all batch elements and all 4 pool offsets.
    conv = jnp.dot(cw_ref[...], p_ref[...],
                   preferred_element_type=jnp.float32)        # (50, batch*4*SEG)
    lw = lw_ref[...]                                          # (5, 50, 200)
    cb = cb_ref[...]                                          # (50, 1)

    cols = []
    for b in range(batch):                                    # static unroll (small B)
        base = b * 4 * SEG                                    # 128-aligned slices
        pooled = conv[:, base:base + SEG]
        for off in range(1, 4):
            pooled = jnp.maximum(
                pooled, conv[:, base + off * SEG: base + (off + 1) * SEG])
        # max(conv + bias) == max(conv) + bias; padded lanes hit zero linear weight below.
        pooled = pooled + cb                                  # (50, SEG)

        # Fused linear: out[b, c] = sum_{ch,s} pooled[ch, s] * lw[c, ch, s]
        prod = pooled[None, :, :PW] * lw                      # (5, 50, 200)  VPU
        col = jnp.sum(jnp.sum(prod, axis=1), axis=1, keepdims=True)   # (5, 1)
        cols.append(col)

    o_ref[...] = jnp.concatenate(cols, axis=1) + lb_ref[...]  # (5, batch)


def build_patches(x):
    """x: (B, 1, H, W) NCHW -> (9, B*4*SEG) im2col patches (XLA glue: pad + static slices).

    tap index t = kh*3 + kw  (matches conv_w[:, 0].reshape(50, 9));
    lane index  = ((b*4 + off)*SEG + s), off = i*2 + j over the 2x2 pool window,
    s = ph*WP + pw over the pooled 10x20 grid; lanes [PW, SEG) are zero padding.
    """
    B = x.shape[0]
    xp = jnp.pad(x[:, 0], ((0, 0), (1, 1), (1, 1)))           # (B, H+2, W+2), zero pad=1
    taps = []
    for kh in range(KH):
        for kw in range(KW):
            offs = []
            for i in range(2):
                for j in range(2):
                    sl = xp[:, i + kh: i + kh + 2 * HP: 2,
                            j + kw: j + kw + 2 * WP: 2]       # (B, HP, WP)
                    offs.append(sl.reshape(B, PW))
            taps.append(jnp.stack(offs, axis=1))              # (B, 4, PW)
    p = jnp.stack(taps, axis=0)                               # (9, B, 4, PW)
    p = jnp.pad(p, ((0, 0), (0, 0), (0, 0), (0, SEG - PW)))   # (9, B, 4, SEG)
    return p.reshape(KH * KW, B * 4 * SEG)


@jax.jit
def tu_forward(x, conv_w, conv_b, lin_w, lin_b):
    B = x.shape[0]
    patches = build_patches(x)                                # (9, B*4*SEG)
    cw2 = conv_w[:, 0].reshape(C_OUT, KH * KW)                # (50, 9)   free view
    cb2 = conv_b.reshape(C_OUT, 1)                            # (50, 1)
    lw3 = lin_w.reshape(N_CLS, C_OUT, PW)                     # (5, 50, 200) free view, no .T
    lb2 = lin_b.reshape(N_CLS, 1)                             # (5, 1)

    out_t = pl.pallas_call(
        functools.partial(fused_kernel, batch=B),
        out_shape=jax.ShapeDtypeStruct((N_CLS, B), jnp.float32),
    )(patches, cw2, cb2, lw3, lb2)

    return out_t.T                                            # (B, 5), torch layout


def reference_forward(x, conv_w, conv_b, lin_w, lin_b):
    """Pure-JAX reference of the same (inferred) forward pass."""
    B = x.shape[0]
    xp = jnp.pad(x[:, 0], ((0, 0), (1, 1), (1, 1)))
    conv = jnp.zeros((B, C_OUT, H, W), jnp.float32)
    for kh in range(KH):
        for kw in range(KW):
            conv = conv + conv_w[:, 0, kh, kw][None, :, None, None] \
                        * xp[:, None, kh:kh + H, kw:kw + W]
    conv = conv + conv_b[None, :, None, None]
    pooled = conv.reshape(B, C_OUT, HP, 2, WP, 2).max(axis=(3, 5))
    flat = pooled.reshape(B, -1)
    return flat @ lin_w.T + lin_b[None, :]


if __name__ == "__main__":
    key = jax.random.PRNGKey(0)
    k1, k2, k3, k4, k5 = jax.random.split(key, 5)
    # Deterministic synthetic parameters (shapes from the inferred module).
    conv_w = jax.random.normal(k1, (C_OUT, 1, KH, KW), jnp.float32) / 3.0
    conv_b = jax.random.normal(k2, (C_OUT,), jnp.float32) * 0.1
    lin_w = jax.random.normal(k3, (N_CLS, F), jnp.float32) * 0.01
    lin_b = jax.random.normal(k4, (N_CLS,), jnp.float32) * 0.01
    x = jax.random.normal(k5, (2, 1, H, W), jnp.float32)

    out = tu_forward(x, conv_w, conv_b, lin_w, lin_b)
    out = jax.block_until_ready(out)

    ref = reference_forward(x, conv_w, conv_b, lin_w, lin_b)
    assert out.shape == (2, N_CLS)
    assert jnp.allclose(out, ref, rtol=5e-2, atol=5e-2)
    print("KERNEL_OK")
</pallas_src>

<mosaic_0001>
module attributes {stable_mosaic.version = 11 : i64} {
  func.func @fused_kernel(%arg0: memref<9x2048xf32, #tpu.memory_space<vmem>>, %arg1: memref<50x9xf32, #tpu.memory_space<vmem>>, %arg2: memref<50x1xf32, #tpu.memory_space<vmem>>, %arg3: memref<5x50x200xf32, #tpu.memory_space<vmem>>, %arg4: memref<5x1xf32, #tpu.memory_space<vmem>>, %arg5: memref<5x2xf32, #tpu.memory_space<vmem>>) attributes {dimension_semantics = [], scalar_prefetch = 0 : i64, scratch_operands = 0 : i64, tpu.core_type = #tpu.core_type<tc>} {
    %c0 = arith.constant 0 : index
    %c0_0 = arith.constant 0 : index
    %0 = vector.load %arg1[%c0, %c0_0] : memref<50x9xf32, #tpu.memory_space<vmem>>, vector<50x9xf32>
    %c0_1 = arith.constant 0 : index
    %c0_2 = arith.constant 0 : index
    %1 = vector.load %arg0[%c0_1, %c0_2] : memref<9x2048xf32, #tpu.memory_space<vmem>>, vector<9x2048xf32>
    %cst = arith.constant dense<0.000000e+00> : vector<50x2048xf32>
    %2 = tpu.matmul %0, %1, %cst {dimension_numbers = #tpu.dot_dimension_numbers<[1], [0], [0], [1], [0, 0, 1, 1], [], []>} : vector<50x9xf32>, vector<9x2048xf32>, vector<50x2048xf32> -> vector<50x2048xf32>
    %c0_3 = arith.constant 0 : index
    %c0_4 = arith.constant 0 : index
    %c0_5 = arith.constant 0 : index
    %3 = vector.load %arg3[%c0_3, %c0_4, %c0_5] : memref<5x50x200xf32, #tpu.memory_space<vmem>>, vector<5x50x200xf32>
    %c0_6 = arith.constant 0 : index
    %c0_7 = arith.constant 0 : index
    %4 = vector.load %arg2[%c0_6, %c0_7] : memref<50x1xf32, #tpu.memory_space<vmem>>, vector<50x1xf32>
    %5 = vector.extract_strided_slice %2 {offsets = [0, 0], sizes = [50, 256], strides = [1, 1]} : vector<50x2048xf32> to vector<50x256xf32>
    %6 = vector.extract_strided_slice %2 {offsets = [0, 256], sizes = [50, 256], strides = [1, 1]} : vector<50x2048xf32> to vector<50x256xf32>
    %7 = arith.maximumf %5, %6 : vector<50x256xf32>
    %8 = vector.extract_strided_slice %2 {offsets = [0, 512], sizes = [50, 256], strides = [1, 1]} : vector<50x2048xf32> to vector<50x256xf32>
    %9 = arith.maximumf %7, %8 : vector<50x256xf32>
    %10 = vector.extract_strided_slice %2 {offsets = [0, 768], sizes = [50, 256], strides = [1, 1]} : vector<50x2048xf32> to vector<50x256xf32>
    %11 = arith.maximumf %9, %10 : vector<50x256xf32>
    %12 = vector.broadcast %4 : vector<50x1xf32> to vector<50x256xf32>
    %13 = arith.addf %11, %12 : vector<50x256xf32>
    %14 = vector.extract_strided_slice %13 {offsets = [0, 0], sizes = [50, 200], strides = [1, 1]} : vector<50x256xf32> to vector<50x200xf32>
    %15 = vector.shape_cast %14 : vector<50x200xf32> to vector<1x50x200xf32>
    %16 = vector.broadcast %15 : vector<1x50x200xf32> to vector<5x50x200xf32>
    %17 = arith.mulf %16, %3 : vector<5x50x200xf32>
    %cst_8 = arith.constant dense<0.000000e+00> : vector<5x200xf32>
    %18 = vector.multi_reduction <add>, %17, %cst_8 [1] : vector<5x50x200xf32> to vector<5x200xf32>
    %cst_9 = arith.constant dense<0.000000e+00> : vector<5xf32>
    %19 = vector.multi_reduction <add>, %18, %cst_9 [1] : vector<5x200xf32> to vector<5xf32>
    %20 = vector.shape_cast %19 : vector<5xf32> to vector<5x1xf32>
    %21 = vector.extract_strided_slice %2 {offsets = [0, 1024], sizes = [50, 256], strides = [1, 1]} : vector<50x2048xf32> to vector<50x256xf32>
    %22 = vector.extract_strided_slice %2 {offsets = [0, 1280], sizes = [50, 256], strides = [1, 1]} : vector<50x2048xf32> to vector<50x256xf32>
    %23 = arith.maximumf %21, %22 : vector<50x256xf32>
    %24 = vector.extract_strided_slice %2 {offsets = [0, 1536], sizes = [50, 256], strides = [1, 1]} : vector<50x2048xf32> to vector<50x256xf32>
    %25 = arith.maximumf %23, %24 : vector<50x256xf32>
    %26 = vector.extract_strided_slice %2 {offsets = [0, 1792], sizes = [50, 256], strides = [1, 1]} : vector<50x2048xf32> to vector<50x256xf32>
    %27 = arith.maximumf %25, %26 : vector<50x256xf32>
    %28 = vector.broadcast %4 : vector<50x1xf32> to vector<50x256xf32>
    %29 = arith.addf %27, %28 : vector<50x256xf32>
    %30 = vector.extract_strided_slice %29 {offsets = [0, 0], sizes = [50, 200], strides = [1, 1]} : vector<50x256xf32> to vector<50x200xf32>
    %31 = vector.shape_cast %30 : vector<50x200xf32> to vector<1x50x200xf32>
    %32 = vector.broadcast %31 : vector<1x50x200xf32> to vector<5x50x200xf32>
    %33 = arith.mulf %32, %3 : vector<5x50x200xf32>
    %cst_10 = arith.constant dense<0.000000e+00> : vector<5x200xf32>
    %34 = vector.multi_reduction <add>, %33, %cst_10 [1] : vector<5x50x200xf32> to vector<5x200xf32>
    %cst_11 = arith.constant dense<0.000000e+00> : vector<5xf32>
    %35 = vector.multi_reduction <add>, %34, %cst_11 [1] : vector<5x200xf32> to vector<5xf32>
    %36 = vector.shape_cast %35 : vector<5xf32> to vector<5x1xf32>
    %37 = tpu.concatenate %20, %36 in 1 : vector<5x1xf32>, vector<5x1xf32> -> vector<5x2xf32>
    %c0_12 = arith.constant 0 : index
    %c0_13 = arith.constant 0 : index
    %38 = vector.load %arg4[%c0_12, %c0_13] : memref<5x1xf32, #tpu.memory_space<vmem>>, vector<5x1xf32>
    %39 = vector.broadcast %38 : vector<5x1xf32> to vector<5x2xf32>
    %40 = arith.addf %37, %39 : vector<5x2xf32>
    %c0_14 = arith.constant 0 : index
    %c0_15 = arith.constant 0 : index
    %41 = vector.load %arg5[%c0_14, %c0_15] : memref<5x2xf32, #tpu.memory_space<vmem>>, vector<5x2xf32>
    tpu.vector_store %arg5[%c0_14, %c0_15], %40 {strides = array<i32>} : memref<5x2xf32, #tpu.memory_space<vmem>>, vector<5x2xf32>,
    return
  }
}

</mosaic_0001>

<bundles_post_ra>
// kernel: squeeze.3
= control target key start
LH: loop header
LB: loop body
LE: loop exit
PB: predicated region body
PF: predicated region fallthrough
CT: control target
= control target key end

     0   :  { %vm16_vm0 = vcmask 408576   ;;  %s61_s0 = inlined_call_operand.vmem [shape: f32[50,3,3], index: 0, kind: input, shape index: {}]   ;;  %s62_s1 = inlined_call_operand.vmem [shape: f32[50,9], index: 1, kind: output, shape index: {}]  }
   0x1   :  { %v29_v0 = vld [vmem:[%s61_s0 + $0x8] sm:$0xf]  ;;  %v30_v1 = vld [vmem:[%s61_s0 + $0x4] sm:$0xf]  ;;  %v13_v2 = vld [vmem:[%s61_s0] sm:$0xf] }
   0x2   :  { %8 = vst [vmem:[#allocation0 + $0x10] sm:$0xf] %v29_v0  ;;  %12 = vst [vmem:[#allocation0 + $0x8] sm:$0xf] %v30_v1 }
   0x3   :  { %14 = vst [vmem:[#allocation0] sm:$0xf] %v13_v2 }
   0x9   :  { %v19_v4 = vld [vmem:[#allocation0 + $0x8] sm:$0x7]   ;;  %v24_v5 = vld [vmem:[#allocation0 + $0x10] sm:$0x7]  }
   0xa   :  { %v15_v3 = vld [vmem:[#allocation0] sm:$0x7]   ;;  %31 = vst.msk [vmem:[%s62_s1 + $0x3] sm:$0x7] %vm16_vm0, %v19_v4   ;;  %32 = vst.msk [vmem:[%s62_s1 + $0x6] sm:$0x7] %vm16_vm0, %v24_v5  }
   0xb   :  { %17 = vst.msk [vmem:[%s62_s1] sm:$0x7] %vm16_vm0, %v15_v3  }

// kernel: tu_forward.1
= control target key start
LH: loop header
LB: loop body
LE: loop exit
PB: predicated region body
PF: predicated region fallthrough
CT: control target
= control target key end

     0   :  { %vm81_vm0 = vcmask 1040384   ;;  %vm1869_vm1 = vmmov 1   ;;  %v1870_v3 = vmov 0.0   ;;  %v1871_v8 = vmov 0   ;;  %s3350_s0 = inlined_call_operand.vmem [shape: f32[9,2048], index: 0, kind: input, shape index: {}]   ;;  %s3351_s1 = inlined_call_operand.vmem [shape: f32[50,9], index: 1, kind: input, shape index: {}]   ;;  %s3352_s2 = inlined_call_operand.vmem [shape: f32[50,1], index: 2, kind: input, shape index: {}]   ;;  %s3353_s3 = inlined_call_operand.vmem [shape: f32[5,50,200], index: 3, kind: input, shape index: {}]   ;;  %s3354_s4 = inlined_call_operand.vmem [shape: f32[5,1], index: 4, kind: input, shape index: {}]   ;;  %s3355_s5 = inlined_call_operand.vmem [shape: f32[5,2], index: 5, kind: output, shape index: {}]  }
   0x1   :  { %v28_v0 = vld [vmem:[%s3350_s0 + $0x8] sm:$0xff]  ;;  %vm1908_vm2 = vmpackc.low %vm81_vm0, %vm1869_vm1  ;;  %194 = vmatprep.mubr.f32.mxu0 %v1870_v3  ;;  %301 = vmatprep.mubr.f32.mxu1 %v1870_v3  ;;  %v30_v5 = vld [vmem:[%s3350_s0 + $0x18] sm:$0xff]  ;;  %vm59_vm3 = vcmask 72704   ;;  %vm1238_vm4 = vcmask 588800   ;;  %vm1229_vm5 = vcmask 1041408   ;;  %vm1250_vm6 = vcmask 582656  }
   0x2   :  { %v44_v1 = vld [vmem:[%s3350_s0 + $0x88] sm:$0x1]  ;;  %v46_v6 = vld [vmem:[%s3350_s0 + $0x98] sm:$0x1]  ;;  %v27_v7 = vld [vmem:[%s3350_s0] sm:$0xff]  ;;  %1867 = vset.pattern.permute.xlu0 %v1871_v8  ;;  %1868 = vset.pattern.permute.xlu1 %v1871_v8  ;;  %vm1397_vm7 = vcmask 1041409  }
   0x3   :  { %v1816_v4 = vpack.c.bf16 %v44_v1, %v28_v0  ;;  %v1822_v9 = vpack.c.bf16 %v46_v6, %v30_v5  ;;  %v43_v10 = vld [vmem:[%s3350_s0 + $0x80] sm:$0x1]  ;;  %v29_v11 = vld [vmem:[%s3350_s0 + $0x10] sm:$0xff]  ;;  %v32_v16 = vld [vmem:[%s3350_s0 + $0x28] sm:$0xff]  ;;  %vm1399_vm8 = vcmask 1042434   ;;  %vm1401_vm9 = vcmask 1043459  }
   0x4   :  { %v45_v12 = vld [vmem:[%s3350_s0 + $0x90] sm:$0x1]  ;;  %v1819_v13 = vpack.c.bf16 %v43_v10, %v27_v7  ;;  %v1937_v15 = vld [vmem:[%s3351_s1] sm:$0xff]  ;;  %v48_v17 = vld [vmem:[%s3350_s0 + $0xa8] sm:$0x1]  ;;  %vm1403_vm10 = vcmask 1044484  }
   0x5   :  { %1818 = vmatprep.subr.msk.bf16.mxu0 %vm1908_vm2, %v1816_v4  ;;  %v1825_v14 = vpack.c.bf16 %v45_v12, %v29_v11  ;;  %1824 = vmatprep.subr.msk.bf16.mxu1 %vm1908_vm2, %v1822_v9  ;;  %v1828_v18 = vpack.c.bf16 %v48_v17, %v32_v16  ;;  %v31_v19 = vld [vmem:[%s3350_s0 + $0x20] sm:$0xff]  ;;  %v34_v21 = vld [vmem:[%s3350_s0 + $0x38] sm:$0xff]  ;;  %v33_v24 = vld [vmem:[%s3350_s0 + $0x30] sm:$0xff]  ;;  %vm1411_vm11 = vcmask 1044480   ;;  %vm1413_vm12 = vcmask 585728  }
   0x6   :  { %v47_v20 = vld [vmem:[%s3350_s0 + $0xa0] sm:$0x1]  ;;  %1821 = vmatpush1.bf16.msk.msra.mxu0 %vm1908_vm2, %v1819_v13  ;;  %v50_v23 = vld [vmem:[%s3350_s0 + $0xb8] sm:$0x1]  ;;  %v49_v25 = vld [vmem:[%s3350_s0 + $0xb0] sm:$0x1] }
   0x7   :  { %1827 = vmatpush1.bf16.msk.msra.mxu1 %vm1908_vm2, %v1825_v14  ;;  %v1831_v22 = vpack.c.bf16 %v47_v20, %v31_v19  ;;  %1830 = vmatprep.subr.msk.bf16.mxu0 %vm1908_vm2, %v1828_v18  ;;  %v1834_v26 = vpack.c.bf16 %v50_v23, %v34_v21  ;;  %v1837_v27 = vpack.c.bf16 %v49_v25, %v33_v24  ;;  %v36_v28 = vld [vmem:[%s3350_s0 + $0x48] sm:$0xff]  ;;  %v38_v32 = vld [vmem:[%s3350_s0 + $0x58] sm:$0xff]  ;;  %v2011_v35 = vld [vmem:[%s3351_s1 + $0x10] sm:$0xff]  ;;  %vm1729_vm13 = vcmask 7168  }
   0x8   :  { %v52_v29 = vld [vmem:[%s3350_s0 + $0xc8] sm:$0x1]  ;;  %v54_v33 = vld [vmem:[%s3350_s0 + $0xd8] sm:$0x1]  ;;  %v1056_v36 = vld [vmem:[%s3352_s2] sm:$0xff]  ;;  %vm1738_vm14 = vcmask 12288  }
   0x9   :  { %1746 = vmatmul.mubr.msk.f32.vlgmr.msra.gmra.mrb[0].mxu0 %vm59_vm3, %v1937_v15  ;;  %1836 = vmatprep.subr.msk.bf16.mxu1 %vm1908_vm2, %v1834_v26  ;;  %v1988_v30 = vld [vmem:[%s3351_s1 + $0x8] sm:$0xff]  ;;  %v1840_v31 = vpack.c.bf16 %v52_v29, %v36_v28  ;;  %v1846_v34 = vpack.c.bf16 %v54_v33, %v38_v32  ;;  %v1058_v37 = vld [vmem:[%s3352_s2 + $0x10] sm:$0xff]  ;;  %v1059_v39 = vld [vmem:[%s3352_s2 + $0x18] sm:$0xff] }
   0xa   :  { %1755 = vmatmul.mubr.msk.f32.vlgmr.msra.gmra.mrb[0].mxu1 %vm59_vm3, %v1937_v15  ;;  %1833 = vmatpush1.bf16.msk.msra.mxu0 %vm1908_vm2, %v1831_v22  ;;  %v1057_v38 = vld [vmem:[%s3352_s2 + $0x8] sm:$0xff]  ;;  %v2036_v40 = vld [vmem:[%s3351_s1 + $0x18] sm:$0xff]  ;;  %v1060_v41 = vld [vmem:[%s3352_s2 + $0x20] sm:$0xff] }
   0xb   :  { %200 = vmatprep.mubr.f32.mxu0 %v1870_v3  ;;  %307 = vmatprep.mubr.f32.mxu1 %v1870_v3  ;;  %v1061_v42 = vld [vmem:[%s3352_s2 + $0x28] sm:$0xff]  ;;  %v2053_v43 = vld [vmem:[%s3351_s1 + $0x20] sm:$0xff]  ;;  %v1062_v44 = vld [vmem:[%s3352_s2 + $0x30] sm:$0x3] }
   0xc   :  { %1839 = vmatpush1.bf16.msk.msra.mxu1 %vm1908_vm2, %v1837_v27  ;;  %1842 = vmatprep.subr.msk.bf16.mxu0 %vm1908_vm2, %v1840_v31  ;;  %v2067_v45 = vld [vmem:[%s3351_s1 + $0x28] sm:$0xff]  ;;  %v2078_v46 = vld [vmem:[%s3351_s1 + $0x30] sm:$0x3]  ;;  %v35_v47 = vld [vmem:[%s3350_s0 + $0x40] sm:$0xff] }
   0xd   :  { %1747 = vmatmul.mubr.msk.f32.gmra.mrb[2].mxu0 %vm59_vm3, %v1988_v30  ;;  %1848 = vmatprep.subr.msk.bf16.mxu1 %vm1908_vm2, %v1846_v34  ;;  %v51_v48 = vld [vmem:[%s3350_s0 + $0xc0] sm:$0x1]  ;;  %v37_v49 = vld [vmem:[%s3350_s0 + $0x50] sm:$0xff]  ;;  %v40_v51 = vld [vmem:[%s3350_s0 + $0x68] sm:$0xff] }
   0xe   :  { %1756 = vmatmul.mubr.msk.f32.gmra.mrb[2].mxu1 %vm59_vm3, %v1988_v30  ;;  %206 = vmatprep.mubr.f32.mxu0 %v1870_v3  ;;  %v53_v50 = vld [vmem:[%s3350_s0 + $0xd0] sm:$0x1]  ;;  %v56_v52 = vld [vmem:[%s3350_s0 + $0xe8] sm:$0x1]  ;;  %v42_v53 = vld [vmem:[%s3350_s0 + $0x78] sm:$0xff]  ;;  %v1843_v55 = vpack.c.bf16 %v51_v48, %v35_v47 }
   0xf   :  { %313 = vmatprep.mubr.f32.mxu1 %v1870_v3  ;;  %1107 = vperm.xlu0 %1867, %v1056_v36   ;;  %v58_v54 = vld [vmem:[%s3350_s0 + $0xf8] sm:$0x1]  ;;  %v1849_v56 = vpack.c.bf16 %v53_v50, %v37_v49  ;;  %v1852_v57 = vpack.c.bf16 %v56_v52, %v40_v51  ;;  %v39_v59 = vld [vmem:[%s3350_s0 + $0x60] sm:$0xff]  ;;  %v41_v61 = vld [vmem:[%s3350_s0 + $0x70] sm:$0xff] }
  0x10   :  { %1117 = vperm.xlu1 %1868, %v1058_v37   ;;  %v1858_v58 = vpack.c.bf16 %v58_v54, %v42_v53  ;;  %v55_v60 = vld [vmem:[%s3350_s0 + $0xe0] sm:$0x1]  ;;  %v57_v62 = vld [vmem:[%s3350_s0 + $0xf0] sm:$0x1]  ;;  %v2328_v53 = vld [vmem:[%s3353_s3 + $0x8] sm:$0xff] }
  0x11   :  { %1748 = vmatmul.mubr.msk.f32.gmra.mrb[4].mxu0 %vm59_vm3, %v2011_v35  ;;  %v1855_v63 = vpack.c.bf16 %v55_v60, %v39_v59  ;;  %v1861_v0 = vpack.c.bf16 %v57_v62, %v41_v61  ;;  %v2323_v52 = vld [vmem:[%s3353_s3] sm:$0xff]  ;;  %3457 = vst [vmem:[#allocation3_spill] sm:$0xff] %v2328_v53  ;;  %v2433_v33 = vld [vmem:[%s3353_s3 + $0x1d0] sm:$0xff] }
  0x12   :  { %1757 = vmatmul.mubr.msk.f32.gmra.mrb[4].mxu1 %vm59_vm3, %v2011_v35  ;;  %212 = vmatprep.mubr.f32.mxu0 %v1870_v3  ;;  %3456 = vst [vmem:[#allocation2_spill] sm:$0xff] %v2323_v52  ;;  %3475 = vst [vmem:[#allocation21_spill] sm:$0xff] %v2433_v33 }
  0x13   :  { %319 = vmatprep.mubr.f32.mxu1 %v1870_v3  ;;  %1112 = vperm.xlu0 %1867, %v1057_v38  }
  0x14   :  { %1122 = vperm.xlu1 %1868, %v1059_v39   ;;  %v2417_v39 = vld [vmem:[%s3353_s3 + $0xf8] sm:$0xff] }
  0x15   :  { %1749 = vmatmul.mubr.msk.f32.gmra.mrb[6].mxu0 %vm59_vm3, %v2036_v40  ;;  %3472 = vst [vmem:[#allocation18_spill] sm:$0xff] %v2417_v39 }
  0x16   :  { %1758 = vmatmul.mubr.msk.f32.gmra.mrb[6].mxu1 %vm59_vm3, %v2036_v40  ;;  %218 = vmatprep.mubr.f32.mxu0 %v1870_v3 }
  0x17   :  { %325 = vmatprep.mubr.f32.mxu1 %v1870_v3  ;;  %1127 = vperm.xlu0 %1867, %v1060_v41  }
  0x18   :  { %1132 = vperm.xlu1 %1868, %v1061_v42   ;;  %v2412_v42 = vld [vmem:[%s3353_s3 + $0xf0] sm:$0xff] }
  0x19   :  { %1750 = vmatmul.mubr.msk.f32.gmra.mrb[8].mxu0 %vm59_vm3, %v2053_v43  ;;  %3471 = vst [vmem:[#allocation17_spill] sm:$0xff] %v2412_v42 }
  0x1a   :  { %1759 = vmatmul.mubr.msk.f32.gmra.mrb[8].mxu1 %vm59_vm3, %v2053_v43  ;;  %224 = vmatprep.mubr.f32.mxu0 %v1870_v3 }
  0x1b   :  { %331 = vmatprep.mubr.f32.mxu1 %v1870_v3  ;;  %1137 = vperm.xlu0 %1867, %v1062_v44  }
  0x1d   :  { %1751 = vmatmul.mubr.msk.f32.gmra.mrb[10].mxu0 %vm59_vm3, %v2067_v45 }
  0x1e   :  { %1760 = vmatmul.mubr.msk.f32.gmra.mrb[10].mxu1 %vm59_vm3, %v2067_v45  ;;  %230 = vmatprep.mubr.f32.mxu0 %v1870_v3 }
  0x1f   :  { %337 = vmatprep.mubr.f32.mxu1 %v1870_v3 }
  0x21   :  { %1752 = vmatmul.mubr.msk.f32.gmra.mrb[12].mxu0 %vm59_vm3, %v2078_v46 }
  0x22   :  { %1761 = vmatmul.mubr.msk.f32.gmra.mrb[12].mxu1 %vm59_vm3, %v2078_v46  ;;  %408 = vmatprep.mubr.f32.mxu0 %v1870_v3 }
  0x23   :  { %515 = vmatprep.mubr.f32.mxu1 %v1870_v3 }
  0x25   :  { %1764 = vmatmul.mubr.msk.f32.vlgmr.msra.gmra.mrb[14].mxu0 %vm59_vm3, %v1937_v15 }
  0x26   :  { %1773 = vmatmul.mubr.msk.f32.vlgmr.msra.gmra.mrb[14].mxu1 %vm59_vm3, %v1937_v15  ;;  %1845 = vmatpush1.bf16.msk.msra.mxu0 %vm1908_vm2, %v1843_v55 }
  0x27   :  { %414 = vmatprep.mubr.f32.mxu0 %v1870_v3  ;;  %521 = vmatprep.mubr.f32.mxu1 %v1870_v3 }
  0x28   :  { %1851 = vmatpush1.bf16.msk.msra.mxu1 %vm1908_vm2, %v1849_v56  ;;  %1854 = vmatprep.subr.msk.bf16.mxu0 %vm1908_vm2, %v1852_v57  ;;  %v2333_v56 = vld [vmem:[%s3353_s3 + $0x78] sm:$0xff]  ;;  %v2338_v57 = vld [vmem:[%s3353_s3 + $0xe8] sm:$0xff] }
  0x29   :  { %1860 = vmatprep.subr.msk.bf16.mxu1 %vm1908_vm2, %v1858_v58  ;;  %1765 = vmatmul.mubr.msk.f32.gmra.mrb[16].mxu0 %vm59_vm3, %v1988_v30  ;;  %3458 = vst [vmem:[#allocation4_spill] sm:$0xff] %v2333_v56  ;;  %3459 = vst [vmem:[#allocation5_spill] sm:$0xff] %v2338_v57  ;;  %v2343_v58 = vld [vmem:[%s3353_s3 + $0x158] sm:$0xff] }
  0x2a   :  { %1774 = vmatmul.mubr.msk.f32.gmra.mrb[16].mxu1 %vm59_vm3, %v1988_v30  ;;  %420 = vmatprep.mubr.f32.mxu0 %v1870_v3  ;;  %3460 = vst [vmem:[#allocation6_spill] sm:$0xff] %v2343_v58 }
  0x2b   :  { %527 = vmatprep.mubr.f32.mxu1 %v1870_v3 }
  0x2d   :  { %1766 = vmatmul.mubr.msk.f32.gmra.mrb[18].mxu0 %vm59_vm3, %v2011_v35 }
  0x2e   :  { %1775 = vmatmul.mubr.msk.f32.gmra.mrb[18].mxu1 %vm59_vm3, %v2011_v35  ;;  %426 = vmatprep.mubr.f32.mxu0 %v1870_v3 }
  0x2f   :  { %533 = vmatprep.mubr.f32.mxu1 %v1870_v3 }
  0x31   :  { %1767 = vmatmul.mubr.msk.f32.gmra.mrb[20].mxu0 %vm59_vm3, %v2036_v40 }
  0x32   :  { %1776 = vmatmul.mubr.msk.f32.gmra.mrb[20].mxu1 %vm59_vm3, %v2036_v40  ;;  %432 = vmatprep.mubr.f32.mxu0 %v1870_v3 }
  0x33   :  { %539 = vmatprep.mubr.f32.mxu1 %v1870_v3 }
  0x35   :  { %1768 = vmatmul.mubr.msk.f32.gmra.mrb[22].mxu0 %vm59_vm3, %v2053_v43 }
  0x36   :  { %1777 = vmatmul.mubr.msk.f32.gmra.mrb[22].mxu1 %vm59_vm3, %v2053_v43  ;;  %438 = vmatprep.mubr.f32.mxu0 %v1870_v3 }
  0x37   :  { %545 = vmatprep.mubr.f32.mxu1 %v1870_v3 }
  0x39   :  { %1769 = vmatmul.mubr.msk.f32.gmra.mrb[24].mxu0 %vm59_vm3, %v2067_v45 }
  0x3a   :  { %1778 = vmatmul.mubr.msk.f32.gmra.mrb[24].mxu1 %vm59_vm3, %v2067_v45  ;;  %444 = vmatprep.mubr.f32.mxu0 %v1870_v3 }
  0x3b   :  { %551 = vmatprep.mubr.f32.mxu1 %v1870_v3 }
  0x3d   :  { %1770 = vmatmul.mubr.msk.f32.gmra.mrb[26].mxu0 %vm59_vm3, %v2078_v46 }
  0x3e   :  { %1779 = vmatmul.mubr.msk.f32.gmra.mrb[26].mxu1 %vm59_vm3, %v2078_v46  ;;  %622 = vmatprep.mubr.f32.mxu0 %v1870_v3 }
  0x3f   :  { %729 = vmatprep.mubr.f32.mxu1 %v1870_v3 }
  0x41   :  { %1782 = vmatmul.mubr.msk.f32.vlgmr.msra.gmra.mrb[28].mxu0 %vm59_vm3, %v1937_v15 }
  0x42   :  { %1791 = vmatmul.mubr.msk.f32.vlgmr.msra.gmra.mrb[28].mxu1 %vm59_vm3, %v1937_v15  ;;  %1857 = vmatpush1.bf16.msk.msra.mxu0 %vm1908_vm2, %v1855_v63  ;;  %v2349_v63 = vld [vmem:[%s3353_s3 + $0x70] sm:$0xff] }
  0x43   :  { %628 = vmatprep.mubr.f32.mxu0 %v1870_v3  ;;  %735 = vmatprep.mubr.f32.mxu1 %v1870_v3  ;;  %3461 = vst [vmem:[#allocation7_spill] sm:$0xff] %v2349_v63 }
  0x44   :  { %1863 = vmatpush1.bf16.msk.msra.mxu1 %vm1908_vm2, %v1861_v0  ;;  %v2354_v0 = vld [vmem:[%s3353_s3 + $0x1c8] sm:$0xff] }
  0x45   :  { %1783 = vmatmul.mubr.msk.f32.gmra.mrb[30].mxu0 %vm59_vm3, %v1988_v30  ;;  %3462 = vst [vmem:[#allocation8_spill] sm:$0xff] %v2354_v0 }
  0x46   :  { %1792 = vmatmul.mubr.msk.f32.gmra.mrb[30].mxu1 %vm59_vm3, %v1988_v30  ;;  %634 = vmatprep.mubr.f32.mxu0 %v1870_v3 }
  0x47   :  { %741 = vmatprep.mubr.f32.mxu1 %v1870_v3 }
  0x49   :  { %1784 = vmatmul.mubr.msk.f32.gmra.mrb[32].mxu0 %vm59_vm3, %v2011_v35 }
  0x4a   :  { %1793 = vmatmul.mubr.msk.f32.gmra.mrb[32].mxu1 %vm59_vm3, %v2011_v35  ;;  %640 = vmatprep.mubr.f32.mxu0 %v1870_v3 }
  0x4b   :  { %747 = vmatprep.mubr.f32.mxu1 %v1870_v3 }
  0x4d   :  { %1785 = vmatmul.mubr.msk.f32.gmra.mrb[34].mxu0 %vm59_vm3, %v2036_v40 }
  0x4e   :  { %1794 = vmatmul.mubr.msk.f32.gmra.mrb[34].mxu1 %vm59_vm3, %v2036_v40  ;;  %646 = vmatprep.mubr.f32.mxu0 %v1870_v3 }
  0x4f   :  { %753 = vmatprep.mubr.f32.mxu1 %v1870_v3 }
  0x51   :  { %1786 = vmatmul.mubr.msk.f32.gmra.mrb[36].mxu0 %vm59_vm3, %v2053_v43 }
  0x52   :  { %1795 = vmatmul.mubr.msk.f32.gmra.mrb[36].mxu1 %vm59_vm3, %v2053_v43  ;;  %652 = vmatprep.mubr.f32.mxu0 %v1870_v3 }
  0x53   :  { %759 = vmatprep.mubr.f32.mxu1 %v1870_v3 }
  0x55   :  { %1787 = vmatmul.mubr.msk.f32.gmra.mrb[38].mxu0 %vm59_vm3, %v2067_v45 }
  0x56   :  { %1796 = vmatmul.mubr.msk.f32.gmra.mrb[38].mxu1 %vm59_vm3, %v2067_v45  ;;  %658 = vmatprep.mubr.f32.mxu0 %v1870_v3 }
  0x57   :  { %765 = vmatprep.mubr.f32.mxu1 %v1870_v3 }
  0x59   :  { %1788 = vmatmul.mubr.msk.f32.gmra.mrb[40].mxu0 %vm59_vm3, %v2078_v46 }
  0x5a   :  { %1797 = vmatmul.mubr.msk.f32.gmra.mrb[40].mxu1 %vm59_vm3, %v2078_v46  ;;  %836 = vmatprep.mubr.f32.mxu0 %v1870_v3 }
  0x5b   :  { %943 = vmatprep.mubr.f32.mxu1 %v1870_v3 }
  0x5d   :  { %1800 = vmatmul.mubr.msk.f32.vlgmr.msra.gmra.mrb[42].mxu0 %vm59_vm3, %v1937_v15 }
  0x5e   :  { %1809 = vmatmul.mubr.msk.f32.vlgmr.msra.gmra.mrb[42].mxu1 %vm59_vm3, %v1937_v15  ;;  %842 = vmatprep.mubr.f32.mxu0 %v1870_v3 }
  0x5f   :  { %949 = vmatprep.mubr.f32.mxu1 %v1870_v3 }
  0x61   :  { %1801 = vmatmul.mubr.msk.f32.gmra.mrb[44].mxu0 %vm59_vm3, %v1988_v30 }
  0x62   :  { %1810 = vmatmul.mubr.msk.f32.gmra.mrb[44].mxu1 %vm59_vm3, %v1988_v30  ;;  %848 = vmatprep.mubr.f32.mxu0 %v1870_v3 }
  0x63   :  { %955 = vmatprep.mubr.f32.mxu1 %v1870_v3 }
  0x65   :  { %1802 = vmatmul.mubr.msk.f32.gmra.mrb[46].mxu0 %vm59_vm3, %v2011_v35 }
  0x66   :  { %1811 = vmatmul.mubr.msk.f32.gmra.mrb[46].mxu1 %vm59_vm3, %v2011_v35  ;;  %854 = vmatprep.mubr.f32.mxu0 %v1870_v3 }
  0x67   :  { %961 = vmatprep.mubr.f32.mxu1 %v1870_v3 }
  0x69   :  { %1803 = vmatmul.mubr.msk.f32.gmra.mrb[48].mxu0 %vm59_vm3, %v2036_v40 }
  0x6a   :  { %1812 = vmatmul.mubr.msk.f32.gmra.mrb[48].mxu1 %vm59_vm3, %v2036_v40  ;;  %860 = vmatprep.mubr.f32.mxu0 %v1870_v3 }
  0x6b   :  { %967 = vmatprep.mubr.f32.mxu1 %v1870_v3 }
  0x6d   :  { %1804 = vmatmul.mubr.msk.f32.gmra.mrb[50].mxu0 %vm59_vm3, %v2053_v43 }
  0x6e   :  { %1813 = vmatmul.mubr.msk.f32.gmra.mrb[50].mxu1 %vm59_vm3, %v2053_v43  ;;  %866 = vmatprep.mubr.f32.mxu0 %v1870_v3 }
  0x6f   :  { %973 = vmatprep.mubr.f32.mxu1 %v1870_v3 }
  0x71   :  { %1805 = vmatmul.mubr.msk.f32.gmra.mrb[52].mxu0 %vm59_vm3, %v2067_v45 }
  0x72   :  { %1814 = vmatmul.mubr.msk.f32.gmra.mrb[52].mxu1 %vm59_vm3, %v2067_v45  ;;  %872 = vmatprep.mubr.f32.mxu0 %v1870_v3 }
  0x73   :  { %979 = vmatprep.mubr.f32.mxu1 %v1870_v3 }
  0x75   :  { %1806 = vmatmul.mubr.msk.f32.gmra.mrb[54].mxu0 %vm59_vm3, %v2078_v46 }
  0x76   :  { %1815 = vmatmul.mubr.msk.f32.gmra.mrb[54].mxu1 %vm59_vm3, %v2078_v46 }
  0x8e   :  { %v2318_v43 = vpop.permute.xlu0 %1107 }
  0xdc   :  { %v196_v1 = vpop.f32.mrb[0].mxu0 }
  0xdd   :  { %v303_v2 = vpop.f32.mrb[0].mxu1  ;;  %v198_v5 = vpop.f32.mrb[1].mxu0 }
  0xde   :  { %v1063_v4 = vmax.f32 %v196_v1, %v303_v2  ;;  %v305_v6 = vpop.f32.mrb[1].mxu1 }
  0xdf   :  { %v1064_v7 = vmax.f32 %v198_v5, %v305_v6  ;;  %v2365_v5 = vld [vmem:[%s3353_s3 + $0x150] sm:$0xff]  ;;  %v2370_v6 = vld [vmem:[%s3353_s3 + $0x1c0] sm:$0xff] }
  0xe0   :  { %v202_v8 = vpop.f32.mrb[2].mxu0  ;;  %3464 = vst [vmem:[#allocation10_spill] sm:$0xff] %v2365_v5  ;;  %3465 = vst [vmem:[#allocation11_spill] sm:$0xff] %v2370_v6 }
  0xe1   :  { %v309_v9 = vpop.f32.mrb[2].mxu1  ;;  %v204_v11 = vpop.f32.mrb[3].mxu0 }
  0xe2   :  { %v1065_v10 = vmax.f32 %v202_v8, %v309_v9  ;;  %v311_v12 = vpop.f32.mrb[3].mxu1  ;;  %v2373_v8 = vpop.permute.xlu0 %1112 }
  0xe3   :  { %v1066_v13 = vmax.f32 %v204_v11, %v311_v12  ;;  %3466 = vst [vmem:[#allocation12_spill] sm:$0xff] %v2373_v8 }
  0xe4   :  { %v2258_v14 = vpop.f32.mrb[4].mxu0 }
  0xe5   :  { %v2260_v3 = vpop.f32.mrb[4].mxu1  ;;  %v2264_v16 = vpop.f32.mrb[5].mxu0 }
  0xe6   :  { %v1067_v15 = vmax.f32 %v2258_v14, %v2260_v3  ;;  %v2266_v17 = vpop.f32.mrb[5].mxu1 }
  0xe8   :  { %v2270_v19 = vpop.f32.mrb[6].mxu0 }
  0xe9   :  { %v2272_v20 = vpop.f32.mrb[6].mxu1  ;;  %v2276_v22 = vpop.f32.mrb[7].mxu0 }
  0xea   :  { %v2278_v23 = vpop.f32.mrb[7].mxu1 }
  0xec   :  { %v2282_v25 = vpop.f32.mrb[8].mxu0 }
  0xed   :  { %v2284_v26 = vpop.f32.mrb[8].mxu1  ;;  %v2288_v28 = vpop.f32.mrb[9].mxu0 }
  0xee   :  { %v2290_v29 = vpop.f32.mrb[9].mxu1 }
  0xf0   :  { %v2294_v31 = vpop.f32.mrb[10].mxu0 }
  0xf1   :  { %v2296_v32 = vpop.f32.mrb[10].mxu1  ;;  %v2300_v34 = vpop.f32.mrb[11].mxu0 }
  0xf2   :  { %v2302_v35 = vpop.f32.mrb[11].mxu1 }
  0xf4   :  { %v2306_v37 = vpop.f32.mrb[12].mxu0 }
  0xf5   :  { %v2308_v38 = vpop.f32.mrb[12].mxu1  ;;  %v2312_v40 = vpop.f32.mrb[13].mxu0 }
  0xf6   :  { %v2314_v41 = vpop.f32.mrb[13].mxu1 }
  0xf8   :  { %v410_v44 = vpop.f32.mrb[14].mxu0 }
  0xf9   :  { %v517_v45 = vpop.f32.mrb[14].mxu1  ;;  %v1077_v46 = vmax.f32 %v1063_v4, %v410_v44  ;;  %v412_v47 = vpop.f32.mrb[15].mxu0  ;;  %v2360_v4 = vld [vmem:[%s3353_s3 + $0xe0] sm:$0xff] }
  0xfa   :  { %v519_v48 = vpop.f32.mrb[15].mxu1  ;;  %v1078_v49 = vmax.f32 %v1064_v7, %v412_v47  ;;  %3463 = vst [vmem:[#allocation9_spill] sm:$0xff] %v2360_v4 }
  0xfb   :  { %v1091_v50 = vmax.f32 %v1077_v46, %v517_v45 }
  0xfc   :  { %v1092_v51 = vmax.f32 %v1078_v49, %v519_v48  ;;  %v416_v54 = vpop.f32.mrb[16].mxu0  ;;  %v2386_v49 = vld [vmem:[%s3353_s3 + $0x10] sm:$0xff] }
  0xfd   :  { %v523_v55 = vpop.f32.mrb[16].mxu1  ;;  %v1140_v59 = vadd.f32 %v2318_v43, %v1091_v50  ;;  %v1079_v60 = vmax.f32 %v1065_v10, %v416_v54  ;;  %v418_v61 = vpop.f32.mrb[17].mxu0  ;;  %3467 = vst [vmem:[#allocation13_spill] sm:$0xff] %v2386_v49  ;;  %v2391_v50 = vld [vmem:[%s3353_s3 + $0x18] sm:$0xff] }
  0xfe   :  { %v525_v62 = vpop.f32.mrb[17].mxu1  ;;  %v1141_v1 = vadd.f32 %v2318_v43, %v1092_v51  ;;  %v1080_v2 = vmax.f32 %v1066_v13, %v418_v61  ;;  %3468 = vst [vmem:[#allocation14_spill] sm:$0xff] %v2391_v50  ;;  %v2396_v51 = vld [vmem:[%s3353_s3 + $0x80] sm:$0xff] }
  0xff   :  { %v1154_v7 = vmul.f32 %v1140_v59, %v2323_v52  ;;  %v1168_v45 = vmul.f32 %v1140_v59, %v2349_v63  ;;  %v1093_v47 = vmax.f32 %v1079_v60, %v523_v55  ;;  %3469 = vst [vmem:[#allocation15_spill] sm:$0xff] %v2396_v51  ;;  %v1182_v55 = vmul.f32 %v1140_v59, %v2360_v4 }
 0x100   :  { %v1155_v9 = vmul.f32 %v1141_v1, %v2328_v53  ;;  %v1169_v10 = vmul.f32 %v1141_v1, %v2333_v56  ;;  %v1183_v11 = vmul.f32 %v1141_v1, %v2338_v57  ;;  %v1197_v12 = vmul.f32 %v1141_v1, %v2343_v58  ;;  %v422_v13 = vpop.f32.mrb[18].mxu0 }
 0x101   :  { %v2379_v44 = vpop.f32.mrb[18].mxu1  ;;  %v1211_v46 = vmul.f32 %v1141_v1, %v2354_v0  ;;  %v1094_v48 = vmax.f32 %v1080_v2, %v525_v62  ;;  %v424_v54 = vpop.f32.mrb[19].mxu0  ;;  %v1196_v60 = vmul.f32 %v1140_v59, %v2365_v5  ;;  %v1210_v62 = vmul.f32 %v1140_v59, %v2370_v6  ;;  %v2407_v2 = vld [vmem:[%s3353_s3 + $0x88] sm:$0xff]  ;;  %v2423_v59 = vld [vmem:[%s3353_s3 + $0x160] sm:$0xff]  ;;  %v2446_v0 = vld [vmem:[%s3353_s3 + $0x1d8] sm:$0xff] }
 0x102   :  { %v2398_v61 = vpop.f32.mrb[19].mxu1  ;;  %v1239_v1 = vsel %vm1238_vm4, %v1155_v9, 0.0  ;;  %3470 = vst [vmem:[#allocation16_spill] sm:$0xff] %v2407_v2  ;;  %v1272_v36 = vsel %vm1238_vm4, %v1169_v10, 0.0  ;;  %3473 = vst [vmem:[#allocation19_spill] sm:$0xff] %v2423_v59  ;;  %v2428_v9 = vld [vmem:[%s3353_s3 + $0x168] sm:$0xff]  ;;  %v1142_v30 = vadd.f32 %v2373_v8, %v1093_v47  ;;  %v1081_v10 = vmax.f32 %v1067_v15, %v422_v13 }
 0x103   :  { %3474 = vst [vmem:[#allocation20_spill] sm:$0xff] %v2428_v9  ;;  %v1143_v27 = vadd.f32 %v2373_v8, %v1094_v48  ;;  %v1304_v24 = vsel %vm1238_vm4, %v1183_v11, 0.0  ;;  %v1336_v21 = vsel %vm1238_vm4, %v1197_v12, 0.0  ;;  %v1368_v18 = vsel %vm1238_vm4, %v1211_v46, 0.0  ;;  %3476 = vst [vmem:[#allocation22_spill] sm:$0xff] %v2446_v0 }
 0x104   :  { %v3477_v47 = vmax.f32 %v2264_v16, %v2266_v17  ;;  %v428_v48 = vpop.f32.mrb[20].mxu0  ;;  %v1156_v14 = vmul.f32 %v1142_v30, %v2386_v49  ;;  %v1170_v15 = vmul.f32 %v1142_v30, %v2396_v51  ;;  %v1184_v46 = vmul.f32 %v1142_v30, %v2412_v42 }
 0x105   :  { %v2451_v57 = vpop.f32.mrb[20].mxu1  ;;  %v1157_v3 = vmul.f32 %v1143_v27, %v2391_v50  ;;  %v1171_v11 = vmul.f32 %v1143_v27, %v2407_v2  ;;  %v430_v12 = vpop.f32.mrb[21].mxu0  ;;  %v1185_v56 = vmul.f32 %v1143_v27, %v2417_v39  ;;  %v1198_v16 = vmul.f32 %v1142_v30, %v2423_v59 }
 0x106   :  { %v1082_v58 = vmax.f32 %v3477_v47, %v424_v54  ;;  %v2457_v13 = vpop.f32.mrb[21].mxu1  ;;  %v1199_v17 = vmul.f32 %v1143_v27, %v2428_v9  ;;  %v1212_v54 = vmul.f32 %v1142_v30, %v2433_v33  ;;  %v1213_v47 = vmul.f32 %v1143_v27, %v2446_v0 }
 0x107   :  { %v1224_v50 = vadd.f32 %v1156_v14, %v1154_v7  ;;  %v1240_v51 = vsel %vm1238_vm4, %v1157_v3, 0.0  ;;  %v1259_v2 = vadd.f32 %v1170_v15, %v1168_v45  ;;  %v1273_v53 = vsel %vm1238_vm4, %v1171_v11, 0.0  ;;  %v2556_v11 = vld [vmem:[%s3353_s3 + $0x1e0] sm:$0xff] }
 0x108   :  { %v1241_v49 = vadd.f32 %v1240_v51, %v1239_v1  ;;  %v1291_v6 = vadd.f32 %v1184_v46, %v1182_v55  ;;  %v434_v5 = vpop.f32.mrb[22].mxu0  ;;  %v1274_v39 = vadd.f32 %v1273_v53, %v1272_v36  ;;  %v1305_v59 = vsel %vm1238_vm4, %v1185_v56, 0.0  ;;  %v2474_v51 = vpop.permute.xlu1 %1117  ;;  %v2483_v53 = vld [vmem:[%s3353_s3 + $0x20] sm:$0xff]  ;;  %3492 = vst [vmem:[#allocation32_spill] sm:$0xff] %v2556_v11 }
 0x109   :  { %v2467_v42 = vpop.f32.mrb[22].mxu1  ;;  %v1323_v4 = vadd.f32 %v1198_v16, %v1196_v60  ;;  %v1337_v9 = vsel %vm1238_vm4, %v1199_v17, 0.0  ;;  %v436_v30 = vpop.f32.mrb[23].mxu0  ;;  %v1306_v27 = vadd.f32 %v1305_v59, %v1304_v24  ;;  %v1355_v14 = vadd.f32 %v1212_v54, %v1210_v62  ;;  %3478 = vst [vmem:[#allocation23_spill] sm:$0xff] %v2474_v51  ;;  %3479 = vst [vmem:[#allocation24_spill] sm:$0xff] %v2483_v53 }
 0x10a   :  { %v2471_v33 = vpop.f32.mrb[23].mxu1  ;;  %v1338_v7 = vadd.f32 %v1337_v9, %v1336_v21  ;;  %v1369_v45 = vsel %vm1238_vm4, %v1213_v47, 0.0  ;;  %v1095_v1 = vmax.f32 %v1081_v10, %v2379_v44  ;;  %v1096_v36 = vmax.f32 %v1082_v58, %v2398_v61  ;;  %v2488_v21 = vld [vmem:[%s3353_s3 + $0x28] sm:$0xff]  ;;  %v2503_v58 = vld [vmem:[%s3353_s3 + $0x98] sm:$0xff]  ;;  %v2508_v44 = vld [vmem:[%s3353_s3 + $0x100] sm:$0xff] }
 0x10b   :  { %v2476_v55 = vadd.f32 %v1369_v45, %v1368_v18  ;;  %3480 = vst [vmem:[#allocation25_spill] sm:$0xff] %v2488_v21  ;;  %v3481_v24 = vmax.f32 %v2270_v19, %v2272_v20  ;;  %v2498_v18 = vld [vmem:[%s3353_s3 + $0x90] sm:$0xff]  ;;  %3483 = vst [vmem:[#allocation27_spill] sm:$0xff] %v2503_v58  ;;  %v3485_v19 = vmax.f32 %v2276_v22, %v2278_v23  ;;  %v2540_v23 = vld [vmem:[%s3353_s3 + $0x178] sm:$0xff] }
 0x10c   :  { %3482 = vst [vmem:[#allocation26_spill] sm:$0xff] %v2498_v18  ;;  %3484 = vst [vmem:[#allocation28_spill] sm:$0xff] %v2508_v44  ;;  %v3486_v61 = vmax.f32 %v2282_v25, %v2284_v26  ;;  %v3487_v62 = vmax.f32 %v2288_v28, %v2290_v29  ;;  %v440_v9 = vpop.f32.mrb[24].mxu0  ;;  %v2535_v22 = vld [vmem:[%s3353_s3 + $0x170] sm:$0xff]  ;;  %v1144_v25 = vadd.f32 %v2474_v51, %v1095_v1 }
 0x10d   :  { %v2493_v56 = vmax.f32 %v3481_v24, %v428_v48  ;;  %v2513_v20 = vmax.f32 %v3485_v19, %v430_v12  ;;  %v2525_v10 = vpop.f32.mrb[24].mxu1  ;;  %v2530_v48 = vld [vmem:[%s3353_s3 + $0x108] sm:$0xff]  ;;  %3489 = vst [vmem:[#allocation30_spill] sm:$0xff] %v2535_v22  ;;  %3490 = vst [vmem:[#allocation31_spill] sm:$0xff] %v2540_v23  ;;  %v1145_v26 = vadd.f32 %v2474_v51, %v1096_v36  ;;  %v442_v3 = vpop.f32.mrb[25].mxu0 }
 0x10e   :  { %v2518_v60 = vmax.f32 %v3486_v61, %v434_v5  ;;  %v2523_v59 = vmax.f32 %v3487_v62, %v436_v30  ;;  %3488 = vst [vmem:[#allocation29_spill] sm:$0xff] %v2530_v48  ;;  %v3491_v29 = vmax.f32 %v2294_v31, %v2296_v32  ;;  %v2551_v15 = vpop.f32.mrb[25].mxu1  ;;  %v2561_v12 = vld [vmem:[%s3353_s3 + $0x1e8] sm:$0xff]  ;;  %v3494_v46 = vmax.f32 %v2300_v34, %v2302_v35 }
 0x10f   :  { %v1097_v28 = vmax.f32 %v2493_v56, %v2451_v57  ;;  %3493 = vst [vmem:[#allocation33_spill] sm:$0xff] %v2561_v12  ;;  %v1098_v57 = vmax.f32 %v2513_v20, %v2457_v13  ;;  %v1158_v17 = vmul.f32 %v1144_v25, %v2483_v53  ;;  %v1159_v54 = vmul.f32 %v1145_v26, %v2488_v21 }
 0x110   :  { %v2549_v5 = vmax.f32 %v3491_v29, %v440_v9  ;;  %v1099_v31 = vmax.f32 %v2518_v60, %v2467_v42  ;;  %v1100_v32 = vmax.f32 %v2523_v59, %v2471_v33  ;;  %v2572_v16 = vmax.f32 %v3494_v46, %v442_v3  ;;  %v446_v1 = vpop.f32.mrb[26].mxu0  ;;  %v2592_v9 = vpop.permute.xlu1 %1122  ;;  %v2601_v46 = vld [vmem:[%s3353_s3 + $0x30] sm:$0xff] }
 0x111   :  { %v1172_v47 = vmul.f32 %v1144_v25, %v2498_v18  ;;  %v1173_v30 = vmul.f32 %v1145_v26, %v2503_v58  ;;  %v1186_v13 = vmul.f32 %v1144_v25, %v2508_v44  ;;  %v1187_v42 = vmul.f32 %v1145_v26, %v2530_v48  ;;  %v2582_v34 = vpop.f32.mrb[26].mxu1  ;;  %v2587_v19 = vpop.f32.mrb[27].mxu0  ;;  %3495 = vst [vmem:[#allocation34_spill] sm:$0xff] %v2592_v9 }
 0x112   :  { %v1200_v45 = vmul.f32 %v1144_v25, %v2535_v22  ;;  %v1201_v33 = vmul.f32 %v1145_v26, %v2540_v23  ;;  %v1214_v35 = vmul.f32 %v1144_v25, %v2556_v11  ;;  %v1215_v36 = vmul.f32 %v1145_v26, %v2561_v12  ;;  %v2589_v20 = vpop.f32.mrb[27].mxu1  ;;  %v2594_v29 = vpop.permute.xlu0 %1127  ;;  %3497 = vst [vmem:[#allocation36_spill] sm:$0xff] %v2601_v46 }
 0x113   :  { %v1225_v24 = vadd.f32 %v1224_v50, %v1158_v17  ;;  %v1242_v56 = vsel %vm1238_vm4, %v1159_v54, 0.0  ;;  %v1260_v60 = vadd.f32 %v1259_v2, %v1172_v47  ;;  %v1275_v62 = vsel %vm1238_vm4, %v1173_v30, 0.0  ;;  %3496 = vst [vmem:[#allocation35_spill] sm:$0xff] %v2594_v29  ;;  %v2619_v54 = vld [vmem:[%s3353_s3 + $0xa8] sm:$0xff]  ;;  %v2624_v47 = vld [vmem:[%s3353_s3 + $0x110] sm:$0xff]  ;;  %v2636_v30 = vld [vmem:[%s3353_s3 + $0x118] sm:$0xff] }
 0x114   :  { %v1243_v61 = vadd.f32 %v1242_v56, %v1241_v49  ;;  %v1292_v59 = vadd.f32 %v1291_v6, %v1186_v13  ;;  %v1276_v3 = vadd.f32 %v1275_v62, %v1274_v39  ;;  %v1307_v25 = vsel %vm1238_vm4, %v1187_v42, 0.0  ;;  %v2606_v49 = vld [vmem:[%s3353_s3 + $0x38] sm:$0xff]  ;;  %3500 = vst [vmem:[#allocation39_spill] sm:$0xff] %v2619_v54  ;;  %3501 = vst [vmem:[#allocation40_spill] sm:$0xff] %v2624_v47  ;;  %v2641_v13 = vld [vmem:[%s3353_s3 + $0x180] sm:$0xff] }
 0x115   :  { %v1324_v26 = vadd.f32 %v1323_v4, %v1200_v45  ;;  %v1339_v50 = vsel %vm1238_vm4, %v1201_v33, 0.0  ;;  %3498 = vst [vmem:[#allocation37_spill] sm:$0xff] %v2606_v49  ;;  %v1308_v6 = vadd.f32 %v1307_v25, %v1306_v27  ;;  %v2608_v17 = vadd.f32 %v1355_v14, %v1214_v35  ;;  %v2614_v4 = vld [vmem:[%s3353_s3 + $0xa0] sm:$0xff]  ;;  %v2626_v27 = vpop.f32.mrb[28].mxu0  ;;  %3502 = vst [vmem:[#allocation41_spill] sm:$0xff] %v2636_v30  ;;  %v2646_v42 = vld [vmem:[%s3353_s3 + $0x188] sm:$0xff] }
 0x116   :  { %v1340_v2 = vadd.f32 %v1339_v50, %v1338_v7  ;;  %v1371_v39 = vsel %vm1238_vm4, %v1215_v36, 0.0  ;;  %3499 = vst [vmem:[#allocation38_spill] sm:$0xff] %v2614_v4  ;;  %v2628_v7 = vpop.f32.mrb[28].mxu1  ;;  %3503 = vst [vmem:[#allocation42_spill] sm:$0xff] %v2641_v13  ;;  %v1146_v45 = vadd.f32 %v2592_v9, %v1097_v28  ;;  %v1148_v33 = vadd.f32 %v2594_v29, %v1099_v31  ;;  %v2651_v35 = vpop.f32.mrb[29].mxu0  ;;  %v2658_v56 = vld [vmem:[%s3353_s3 + $0x1f0] sm:$0xff] }
 0x117   :  { %v2631_v14 = vadd.f32 %v1371_v39, %v2476_v55  ;;  %3504 = vst [vmem:[#allocation43_spill] sm:$0xff] %v2646_v42  ;;  %v1147_v55 = vadd.f32 %v2592_v9, %v1098_v57  ;;  %v2653_v36 = vpop.f32.mrb[29].mxu1  ;;  %3505 = vst [vmem:[#allocation44_spill] sm:$0xff] %v2658_v56  ;;  %v2663_v62 = vld [vmem:[%s3353_s3 + $0x1f8] sm:$0xff]  ;;  %v1149_v28 = vadd.f32 %v2594_v29, %v1100_v32 }
 0x118   :  { %3506 = vst [vmem:[#allocation45_spill] sm:$0xff] %v2663_v62  ;;  %v3507_v25 = vmax.f32 %v2306_v37, %v2308_v38  ;;  %v1160_v39 = vmul.f32 %v1146_v45, %v2601_v46  ;;  %v1174_v12 = vmul.f32 %v1146_v45, %v2614_v4  ;;  %v1188_v32 = vmul.f32 %v1146_v45, %v2624_v47  ;;  %v2683_v48 = vpop.f32.mrb[30].mxu0  ;;  %v2725_v47 = vld [vmem:[%s3353_s3 + $0x128] sm:$0xff] }
 0x119   :  { %v1161_v9 = vmul.f32 %v1147_v55, %v2606_v49  ;;  %v1175_v23 = vmul.f32 %v1147_v55, %v2619_v54  ;;  %v1189_v57 = vmul.f32 %v1147_v55, %v2636_v30  ;;  %v1202_v29 = vmul.f32 %v1146_v45, %v2641_v13  ;;  %v2685_v37 = vpop.f32.mrb[30].mxu1  ;;  %v2695_v30 = vld [vmem:[%s3353_s3 + $0x40] sm:$0xff]  ;;  %v2707_v49 = vpop.f32.mrb[31].mxu0  ;;  %3513 = vst [vmem:[#allocation51_spill] sm:$0xff] %v2725_v47 }
 0x11a   :  { %v2673_v50 = vmax.f32 %v3507_v25, %v446_v1  ;;  %v1203_v31 = vmul.f32 %v1147_v55, %v2646_v42  ;;  %v2688_v38 = vmul.f32 %v1146_v45, %v2658_v56  ;;  %v1217_v1 = vmul.f32 %v1147_v55, %v2663_v62  ;;  %3508 = vst [vmem:[#allocation46_spill] sm:$0xff] %v2695_v30  ;;  %v2700_v42 = vld [vmem:[%s3353_s3 + $0x48] sm:$0xff]  ;;  %v2705_v45 = vld [vmem:[%s3353_s3 + $0xb0] sm:$0xff]  ;;  %v2715_v56 = vld [vmem:[%s3353_s3 + $0xb8] sm:$0xff] }
 0x11b   :  { %v1226_v25 = vadd.f32 %v1225_v24, %v1160_v39  ;;  %v1244_v54 = vsel %vm1238_vm4, %v1161_v9, 0.0  ;;  %3509 = vst [vmem:[#allocation47_spill] sm:$0xff] %v2700_v42  ;;  %3510 = vst [vmem:[#allocation48_spill] sm:$0xff] %v2705_v45  ;;  %v2709_v24 = vpop.f32.mrb[31].mxu1  ;;  %v1261_v55 = vadd.f32 %v1260_v60, %v1174_v12  ;;  %v1277_v39 = vsel %vm1238_vm4, %v1175_v23, 0.0  ;;  %v2720_v13 = vld [vmem:[%s3353_s3 + $0x120] sm:$0xff] }
 0x11c   :  { %v1245_v9 = vadd.f32 %v1244_v54, %v1243_v61  ;;  %v1293_v62 = vadd.f32 %v1292_v59, %v1188_v32  ;;  %3511 = vst [vmem:[#allocation49_spill] sm:$0xff] %v2715_v56  ;;  %3512 = vst [vmem:[#allocation50_spill] sm:$0xff] %v2720_v13  ;;  %v1278_v61 = vadd.f32 %v1277_v39, %v1276_v3  ;;  %v1309_v12 = vsel %vm1238_vm4, %v1189_v57, 0.0  ;;  %v2734_v59 = vld [vmem:[%s3353_s3 + $0x190] sm:$0xff]  ;;  %v2739_v54 = vld [vmem:[%s3353_s3 + $0x198] sm:$0xff]  ;;  %v2757_v39 = vpop.f32.mrb[32].mxu0 }
 0x11d   :  { %v2728_v23 = vadd.f32 %v1324_v26, %v1202_v29  ;;  %v1341_v60 = vsel %vm1238_vm4, %v1203_v31, 0.0  ;;  %3514 = vst [vmem:[#allocation52_spill] sm:$0xff] %v2734_v59  ;;  %3515 = vst [vmem:[#allocation53_spill] sm:$0xff] %v2739_v54  ;;  %v2744_v3 = vld [vmem:[%s3353_s3 + $0x200] sm:$0xff]  ;;  %v1310_v57 = vadd.f32 %v1309_v12, %v1308_v6  ;;  %v2749_v26 = vsel %vm1238_vm4, %v1217_v1, 0.0  ;;  %v2754_v31 = vld [vmem:[%s3353_s3 + $0x208] sm:$0xff] }
 0x11e   :  { %3516 = vst [vmem:[#allocation54_spill] sm:$0xff] %v2744_v3  ;;  %v2746_v29 = vadd.f32 %v1341_v60, %v1340_v2  ;;  %3517 = vst [vmem:[#allocation55_spill] sm:$0xff] %v2754_v31  ;;  %v1162_v32 = vmul.f32 %v1148_v33, %v2695_v30  ;;  %v2759_v4 = vpop.f32.mrb[32].mxu1  ;;  %v1163_v46 = vmul.f32 %v1149_v28, %v2700_v42  ;;  %v2765_v12 = vpop.f32.mrb[33].mxu0 }
 0x11f   :  { %v1176_v6 = vmul.f32 %v1148_v33, %v2705_v45  ;;  %v1177_v2 = vmul.f32 %v1149_v28, %v2715_v56  ;;  %v1190_v1 = vmul.f32 %v1148_v33, %v2720_v13  ;;  %v2767_v60 = vpop.f32.mrb[33].mxu1  ;;  %v1191_v58 = vmul.f32 %v1149_v28, %v2725_v47  ;;  %v2777_v42 = vpop.permute.xlu1 %1132  ;;  %v2786_v47 = vld [vmem:[%s3353_s3 + $0x50] sm:$0xff] }
 0x120   :  { %3518 = vst [vmem:[#allocation56_spill] sm:$0xff] %v2767_v60  ;;  %v2771_v30 = vmul.f32 %v1148_v33, %v2734_v59  ;;  %v1205_v21 = vmul.f32 %v1149_v28, %v2739_v54  ;;  %v2775_v11 = vmul.f32 %v1148_v33, %v2744_v3  ;;  %3519 = vst [vmem:[#allocation57_spill] sm:$0xff] %v2777_v42  ;;  %v1246_v45 = vsel %vm1238_vm4, %v1163_v46, 0.0  ;;  %v2791_v54 = vld [vmem:[%s3353_s3 + $0x58] sm:$0xff]  ;;  %v2796_v33 = vld [vmem:[%s3353_s3 + $0xc0] sm:$0xff] }
 0x121   :  { %v2780_v56 = vmul.f32 %v1149_v28, %v2754_v31  ;;  %v1227_v13 = vadd.f32 %v1226_v25, %v1162_v32  ;;  %v1262_v22 = vadd.f32 %v1261_v55, %v1176_v6  ;;  %3520 = vst [vmem:[#allocation58_spill] sm:$0xff] %v2786_v47  ;;  %3521 = vst [vmem:[#allocation59_spill] sm:$0xff] %v2791_v54  ;;  %v1279_v25 = vsel %vm1238_vm4, %v1177_v2, 0.0  ;;  %v2803_v32 = vld [vmem:[%s3353_s3 + $0x130] sm:$0xff]  ;;  %v2808_v6 = vld [vmem:[%s3353_s3 + $0x1a0] sm:$0xff]  ;;  %v2810_v31 = vpop.f32.mrb[34].mxu0 }
 0x122   :  { %3522 = vst [vmem:[#allocation60_spill] sm:$0xff] %v2796_v33  ;;  %v1247_v28 = vadd.f32 %v1246_v45, %v1245_v9  ;;  %v1294_v46 = vadd.f32 %v1293_v62, %v1190_v1  ;;  %v1311_v55 = vsel %vm1238_vm4, %v1191_v58, 0.0  ;;  %3523 = vst [vmem:[#allocation61_spill] sm:$0xff] %v2803_v32  ;;  %v2812_v3 = vpop.f32.mrb[34].mxu1  ;;  %v1280_v45 = vadd.f32 %v1279_v25, %v1278_v61  ;;  %v2822_v62 = vld [vmem:[%s3353_s3 + $0xc8] sm:$0xff]  ;;  %v2827_v2 = vld [vmem:[%s3353_s3 + $0x138] sm:$0xff] }
 0x123   :  { %3524 = vst [vmem:[#allocation62_spill] sm:$0xff] %v2808_v6  ;;  %3525 = vst [vmem:[#allocation63_spill] sm:$0xff] %v2810_v31  ;;  %v2814_v9 = vadd.f32 %v1311_v55, %v1310_v57  ;;  %v2817_v58 = vsel %vm1238_vm4, %v1205_v21, 0.0  ;;  %v2832_v1 = vld [vmem:[%s3353_s3 + $0x1a8] sm:$0xff]  ;;  %v3530_v61 = vmax.f32 %v2549_v5, %v2525_v10  ;;  %v2840_v57 = vpop.f32.mrb[35].mxu0  ;;  %v2842_v25 = vpop.f32.mrb[35].mxu1  ;;  %v3533_v59 = vmax.f32 %v2572_v16, %v2551_v15 }
 0x124   :  { %3526 = vst [vmem:[#allocation64_spill] sm:$0xff] %v2812_v3  ;;  %3527 = vst [vmem:[#allocation65_spill] sm:$0xff] %v2822_v62  ;;  %v2847_v55 = vld [vmem:[%s3353_s3 + $0x218] sm:$0xff]  ;;  %v3534_v10 = vmax.f32 %v2312_v40, %v2314_v41  ;;  %v2871_v40 = vpop.permute.xlu0 %1137 }
 0x125   :  { %3528 = vst [vmem:[#allocation66_spill] sm:$0xff] %v2827_v2  ;;  %3529 = vst [vmem:[#allocation67_spill] sm:$0xff] %v2832_v1  ;;  %v2838_v21 = vadd.f32 %v2777_v42, %v3530_v61  ;;  %v1151_v44 = vadd.f32 %v2777_v42, %v3533_v59  ;;  %v1103_v61 = vmax.f32 %v2673_v50, %v2582_v34  ;;  %v2882_v59 = vld [vmem:[%s3353_s3 + $0x60] sm:$0x3]  ;;  %v2886_v18 = vpop.f32.mrb[36].mxu1 }
 0x126   :  { %3531 = vst [vmem:[#allocation68_spill] sm:$0xff] %v2842_v25  ;;  %3532 = vst [vmem:[#allocation69_spill] sm:$0xff] %v2847_v55  ;;  %v1090_v5 = vmax.f32 %v3534_v10, %v2587_v19  ;;  %v2884_v10 = vpop.f32.mrb[36].mxu0  ;;  %v2924_v42 = vld [vmem:[%s3353_s3 + $0xd8] sm:$0x3] }
 0x127   :  { %v1164_v53 = vmul.f32 %v2838_v21, %v2786_v47  ;;  %v1178_v51 = vmul.f32 %v2838_v21, %v2796_v33  ;;  %v1192_v15 = vmul.f32 %v2838_v21, %v2803_v32  ;;  %v2869_v16 = vmul.f32 %v2838_v21, %v2808_v6  ;;  %3535 = vst [vmem:[#allocation70_spill] sm:$0xff] %v2871_v40  ;;  %v2906_v33 = vld [vmem:[%s3353_s3 + $0x140] sm:$0x3] }
 0x128   :  { %v1165_v41 = vmul.f32 %v1151_v44, %v2791_v54  ;;  %v1179_v34 = vmul.f32 %v1151_v44, %v2822_v62  ;;  %v1193_v19 = vmul.f32 %v1151_v44, %v2827_v2  ;;  %v2877_v50 = vmul.f32 %v1151_v44, %v2832_v1  ;;  %3536 = vst [vmem:[#allocation71_spill] sm:$0xff] %v2882_v59  ;;  %v2896_v1 = vld [vmem:[%s3353_s3 + $0x68] sm:$0x3]  ;;  %v2901_v2 = vld [vmem:[%s3353_s3 + $0xd0] sm:$0x3] }
 0x129   :  { %3537 = vst [vmem:[#allocation72_spill] sm:$0xff] %v2884_v10  ;;  %3538 = vst [vmem:[#allocation73_spill] sm:$0xff] %v2886_v18  ;;  %v2889_v6 = vmul.f32 %v1151_v44, %v2847_v55  ;;  %v1228_v54 = vadd.f32 %v1227_v13, %v1164_v53  ;;  %v1263_v32 = vadd.f32 %v1262_v22, %v1178_v51  ;;  %v2908_v44 = vpop.f32.mrb[37].mxu0  ;;  %v2910_v51 = vpop.f32.mrb[37].mxu1 }
 0x12a   :  { %v2891_v62 = vadd.f32 %v1294_v46, %v1192_v15  ;;  %3539 = vst [vmem:[#allocation74_spill] sm:$0xff] %v2896_v1  ;;  %3540 = vst [vmem:[#allocation75_spill] sm:$0xff] %v2901_v2  ;;  %v1248_v53 = vsel %vm1238_vm4, %v1165_v41, 0.0  ;;  %v1281_v22 = vsel %vm1238_vm4, %v1179_v34, 0.0  ;;  %v1313_v13 = vsel %vm1238_vm4, %v1193_v19, 0.0  ;;  %v2948_v0 = vpop.f32.mrb[38].mxu1 }
 0x12b   :  { %3541 = vst [vmem:[#allocation76_spill] sm:$0xff] %v2906_v33  ;;  %3542 = vst [vmem:[#allocation77_spill] sm:$0xff] %v2908_v44  ;;  %v1104_v46 = vmax.f32 %v1090_v5, %v2589_v20  ;;  %v2919_v15 = vld [vmem:[%s3353_s3 + $0x1b0] sm:$0x3]  ;;  %v1249_v55 = vadd.f32 %v1248_v53, %v1247_v28  ;;  %v1282_v47 = vadd.f32 %v1281_v22, %v1280_v45  ;;  %v2929_v41 = vld [vmem:[%s3353_s3 + $0x148] sm:$0x3] }
 0x12c   :  { %3543 = vst [vmem:[#allocation78_spill] sm:$0xff] %v2910_v51  ;;  %3544 = vst [vmem:[#allocation79_spill] sm:$0xff] %v2919_v15  ;;  %v2934_v20 = vld [vmem:[%s3353_s3 + $0x1b8] sm:$0x3]  ;;  %v1152_v5 = vadd.f32 %v2871_v40, %v1103_v61  ;;  %v2946_v22 = vpop.f32.mrb[38].mxu0  ;;  %v2956_v34 = vpop.f32.mrb[39].mxu1 }
 0x12d   :  { %3545 = vst [vmem:[#allocation80_spill] sm:$0xff] %v2924_v42  ;;  %3546 = vst [vmem:[#allocation81_spill] sm:$0xff] %v2929_v41  ;;  %v1153_v45 = vadd.f32 %v2871_v40, %v1104_v46  ;;  %v2954_v40 = vpop.f32.mrb[39].mxu0  ;;  %v2993_v3 = vpop.f32.mrb[40].mxu1 }
 0x12e   :  { %3547 = vst [vmem:[#allocation82_spill] sm:$0xff] %v2934_v20  ;;  %3548 = vst [vmem:[#allocation83_spill] sm:$0xff] %v2946_v22  ;;  %v1166_v61 = vmul.f32 %v1152_v5, %v2882_v59  ;;  %v1180_v63 = vmul.f32 %v1152_v5, %v2901_v2  ;;  %v1194_v28 = vmul.f32 %v1152_v5, %v2906_v33  ;;  %v2967_v2 = vld [vmem:[%s3353_s3 + $0x210] sm:$0xff]  ;;  %v3005_v25 = vpop.f32.mrb[41].mxu1 }
 0x12f   :  { %3549 = vst [vmem:[#allocation84_spill] sm:$0xff] %v2948_v0  ;;  %v1208_v46 = vmul.f32 %v1152_v5, %v2919_v15  ;;  %3550 = vst [vmem:[#allocation85_spill] sm:$0xff] %v2954_v40  ;;  %v1167_v19 = vmul.f32 %v1153_v45, %v2896_v1  ;;  %v1181_v53 = vmul.f32 %v1153_v45, %v2924_v42  ;;  %v2991_v1 = vpop.f32.mrb[40].mxu0 }
 0x130   :  { %3551 = vst [vmem:[#allocation86_spill] sm:$0xff] %v2956_v34  ;;  %v1195_v52 = vmul.f32 %v1153_v45, %v2929_v41  ;;  %v2962_v8 = vmul.f32 %v1153_v45, %v2934_v20  ;;  %3552 = vst [vmem:[#allocation87_spill] sm:$0xff] %v2967_v2  ;;  %v1230_v15 = vsel %vm1229_vm5, %v1166_v61, 0.0  ;;  %v1264_v33 = vsel %vm1229_vm5, %v1180_v63, 0.0  ;;  %v2978_v20 = vld [vmem:[%s3353_s3 + $0x220] sm:$0x3] }
 0x131   :  { %3553 = vst [vmem:[#allocation88_spill] sm:$0xff] %v2978_v20  ;;  %v2983_v41 = vld [vmem:[%s3353_s3 + $0x228] sm:$0x3]  ;;  %v1251_v61 = vsel %vm1250_vm6, %v1167_v19, 0.0  ;;  %v1283_v63 = vsel %vm1250_vm6, %v1181_v53, 0.0  ;;  %3555 = vst [vmem:[#allocation90_spill] sm:$0xff] %v2991_v1  ;;  %v3011_v18 = vmul.f32 %v2838_v21, %v2967_v2  ;;  %v3014_v31 = vmul.f32 %v1152_v5, %v2978_v20 }
 0x132   :  { %3554 = vst [vmem:[#allocation89_spill] sm:$0xff] %v2983_v41  ;;  %3556 = vst [vmem:[#allocation91_spill] sm:$0xff] %v2993_v3  ;;  %v3003_v59 = vpop.f32.mrb[41].mxu0  ;;  %v3017_v60 = vmul.f32 %v1153_v45, %v2983_v41  ;;  %v1231_v19 = vadd.f32 %v1230_v15, %v1228_v54  ;;  %v1252_v34 = vadd.f32 %v1251_v61, %v1249_v55  ;;  %v1296_v1 = vsel %vm1229_vm5, %v1194_v28, 0.0  ;;  %v3026_v5 = vpop.f32.mrb[42].mxu1 }
 0x133   :  { %3557 = vst [vmem:[#allocation92_spill] sm:$0xff] %v3003_v59  ;;  %3558 = vst [vmem:[#allocation93_spill] sm:$0xff] %v3005_v25  ;;  %v1265_v53 = vadd.f32 %v1264_v33, %v1263_v32  ;;  %v1284_v3 = vadd.f32 %v1283_v63, %v1282_v47  ;;  %v1314_v40 = vadd.f32 %v1313_v13, %v2814_v9  ;;  %v1315_v42 = vsel %vm1250_vm6, %v1195_v52, 0.0  ;;  %v3024_v2 = vpop.f32.mrb[42].mxu0  ;;  %v3030_v47 = vpop.f32.mrb[43].mxu1 }
 0x134   :  { %v1326_v21 = vadd.f32 %v2728_v23, %v2771_v30  ;;  %v1232_v20 = vrot.slane %v1231_v19, 4  ;;  %v1253_v45 = vrot.slane %v1252_v34, 4  ;;  %v3028_v55 = vpop.f32.mrb[43].mxu0  ;;  %v1297_v33 = vadd.f32 %v1296_v1, %v2891_v62 }
 0x135   :  { %v1266_v41 = vrot.slane %v1265_v53, 4  ;;  %v1285_v54 = vrot.slane %v1284_v3, 4  ;;  %v1316_v32 = vadd.f32 %v1315_v42, %v1314_v40  ;;  %v1328_v9 = vsel %vm1229_vm5, %v1208_v46, 0.0  ;;  %v3037_v59 = vpop.f32.mrb[44].mxu0  ;;  %v3039_v0 = vpop.f32.mrb[44].mxu1 }
 0x136   :  { %v1327_v52 = vadd.f32 %v1326_v21, %v2869_v16  ;;  %v1233_v30 = vadd.f32 %v1232_v20, %v1231_v19  ;;  %v1254_v23 = vadd.f32 %v1253_v45, %v1252_v34  ;;  %v1298_v28 = vrot.slane %v1297_v33, 4  ;;  %v3041_v40 = vpop.f32.mrb[45].mxu0  ;;  %v3043_v20 = vpop.f32.mrb[45].mxu1 }
 0x137   :  { %v1267_v13 = vadd.f32 %v1266_v41, %v1265_v53  ;;  %v1286_v15 = vadd.f32 %v1285_v54, %v1284_v3  ;;  %v1317_v61 = vrot.slane %v1316_v32, 4  ;;  %v1344_v25 = vadd.f32 %v2817_v58, %v2746_v29 }
 0x138   :  { %v1329_v63 = vadd.f32 %v1328_v9, %v1327_v52  ;;  %v1234_v62 = vrot.slane %v1233_v30, 2  ;;  %v1255_v42 = vrot.slane %v1254_v23, 2  ;;  %v1299_v3 = vadd.f32 %v1298_v28, %v1297_v33  ;;  %v850_v9 = vpop.f32.mrb[46].mxu0 }
 0x139   :  { %v1268_v1 = vrot.slane %v1267_v13, 2  ;;  %v1287_v16 = vrot.slane %v1286_v15, 2  ;;  %v1318_v41 = vadd.f32 %v1317_v61, %v1316_v32  ;;  %v1345_v46 = vsel %vm1238_vm4, %v2877_v50, 0.0  ;;  %v3047_v22 = vpop.f32.mrb[46].mxu1  ;;  %v3049_v61 = vpop.f32.mrb[47].mxu0 }
 0x13a   :  { %v1330_v34 = vrot.slane %v1329_v63, 4  ;;  %v1235_v29 = vadd.f32 %v1234_v62, %v1233_v30  ;;  %v1256_v58 = vadd.f32 %v1255_v42, %v1254_v23  ;;  %v1300_v21 = vrot.slane %v1299_v3, 2  ;;  %v3051_v50 = vpop.f32.mrb[47].mxu1 }
 0x13b   :  { %v1269_v19 = vadd.f32 %v1268_v1, %v1267_v13  ;;  %v1288_v53 = vadd.f32 %v1287_v16, %v1286_v15  ;;  %v1319_v45 = vrot.slane %v1318_v41, 2  ;;  %v1346_v52 = vadd.f32 %v1345_v46, %v1344_v25 }
 0x13c   :  { %v1331_v54 = vadd.f32 %v1330_v34, %v1329_v63  ;;  %v1236_v51 = vrot.slane %v1235_v29, 1  ;;  %v1257_v33 = vrot.slane %v1256_v58, 1  ;;  %v1301_v30 = vadd.f32 %v1300_v21, %v1299_v3  ;;  %v3055_v44 = vpop.f32.mrb[48].mxu0 }
 0x13d   :  { %v1270_v32 = vrot.slane %v1269_v19, 1  ;;  %v1289_v28 = vrot.slane %v1288_v53, 1  ;;  %v1320_v23 = vadd.f32 %v1319_v45, %v1318_v41  ;;  %v1347_v15 = vsel %vm1250_vm6, %v2962_v8, 0.0  ;;  %v3057_v10 = vpop.f32.mrb[48].mxu1 }
 0x13e   :  { %v1332_v13 = vrot.slane %v1331_v54, 2  ;;  %v1237_v62 = vadd.f32 %v1236_v51, %v1235_v29  ;;  %v1258_v63 = vadd.f32 %v1257_v33, %v1256_v58  ;;  %v1302_v1 = vrot.slane %v1301_v30, 1  ;;  %v3067_v29 = vpop.f32.mrb[49].mxu0  ;;  %v3069_v58 = vpop.f32.mrb[49].mxu1 }
 0x13f   :  { %v1271_v25 = vadd.f32 %v1270_v32, %v1269_v19  ;;  %v1290_v42 = vadd.f32 %v1289_v28, %v1288_v53  ;;  %v1321_v16 = vrot.slane %v1320_v23, 1  ;;  %v1348_v46 = vadd.f32 %v1347_v15, %v1346_v52 }
 0x140   :  { %v1333_v34 = vadd.f32 %v1332_v13, %v1331_v54  ;;  %v1357_v3 = vadd.f32 %v2608_v17, %v2688_v38  ;;  %v1360_v41 = vsel %vm1229_vm5, %v3014_v31, 0.0  ;;  %v1374_v8 = vadd.f32 %v2749_v26, %v2631_v14  ;;  %v3078_v33 = vpop.f32.mrb[50].mxu0 }
 0x141   :  { %v1375_v51 = vsel %vm1238_vm4, %v2780_v56, 0.0  ;;  %v1303_v19 = vadd.f32 %v1302_v1, %v1301_v30  ;;  %v1322_v53 = vadd.f32 %v1321_v16, %v1320_v23  ;;  %v1349_v45 = vrot.slane %v1348_v46, 4  ;;  %v3080_v32 = vpop.f32.mrb[50].mxu1  ;;  %v3085_v23 = vpop.f32.mrb[51].mxu0 }
 0x142   :  { %v1334_v21 = vrot.slane %v1333_v34, 1  ;;  %v1358_v54 = vadd.f32 %v1357_v3, %v2775_v11  ;;  %v1376_v17 = vadd.f32 %v1375_v51, %v1374_v8  ;;  %v1377_v38 = vsel %vm1238_vm4, %v2889_v6, 0.0 }
 0x143   :  { %v1379_v14 = vsel %vm1250_vm6, %v3017_v60, 0.0  ;;  %v1350_v31 = vadd.f32 %v1349_v45, %v1348_v46  ;;  %v1398_v56 = vsel %vm1397_vm7, %v1271_v25, %v1237_v62  ;;  %v1405_v52 = vsel %vm1397_vm7, %v1290_v42, %v1258_v63  ;;  %v3087_v60 = vpop.f32.mrb[51].mxu1  ;;  %v3567_v45 = vld [vmem:[#allocation2_spill] sm:$0xff] }
 0x144   :  { %v1335_v26 = vadd.f32 %v1334_v21, %v1333_v34  ;;  %v1359_v28 = vadd.f32 %v1358_v54, %v3011_v18  ;;  %v1378_v11 = vadd.f32 %v1377_v38, %v1376_v17  ;;  %v1400_v30 = vsel %vm1399_vm8, %v1303_v19, %v1398_v56  ;;  %v3568_v17 = vld [vmem:[#allocation7_spill] sm:$0xff]  ;;  %v3570_v56 = vld [vmem:[#allocation10_spill] sm:$0xff] }
 0x145   :  { %v1406_v6 = vsel %vm1399_vm8, %v1322_v53, %v1405_v52  ;;  %v1351_v13 = vrot.slane %v1350_v31, 2  ;;  %v3559_v62 = vmax.f32 %v2626_v27, %v2628_v7  ;;  %v3560_v18 = vmax.f32 %v2651_v35, %v2653_v36 }
 0x146   :  { %v3090_v15 = vsel %vm1401_vm9, %v1335_v26, %v1400_v30  ;;  %v1361_v42 = vadd.f32 %v1360_v41, %v1359_v28  ;;  %v1380_v1 = vadd.f32 %v1379_v14, %v1378_v11  ;;  %v3561_v16 = vmax.f32 %v2683_v48, %v2685_v37  ;;  %v3571_v28 = vld [vmem:[#allocation11_spill] sm:$0xff] }
 0x147   :  { %v1432_v63 = vmax.f32 %v3559_v62, %v3024_v2  ;;  %v1433_v25 = vmax.f32 %v3560_v18, %v3028_v55  ;;  %v3562_v46 = vmax.f32 %v2707_v49, %v2709_v24  ;;  %v1352_v8 = vadd.f32 %v1351_v13, %v1350_v31  ;;  %v3115_v2 = vpop.f32.mrb[52].mxu0  ;;  %v3117_v55 = vpop.f32.mrb[52].mxu1 }
 0x148   :  { %v1434_v34 = vmax.f32 %v3561_v16, %v3037_v59  ;;  %v3563_v35 = vmax.f32 %v2757_v39, %v2759_v4  ;;  %v1362_v48 = vrot.slane %v1361_v42, 4  ;;  %v1381_v37 = vrot.slane %v1380_v1, 4  ;;  %v3121_v24 = vpop.f32.mrb[53].mxu0 }
 0x149   :  { %v1435_v3 = vmax.f32 %v3562_v46, %v3041_v40  ;;  %v1446_v27 = vmax.f32 %v1432_v63, %v3026_v5  ;;  %v1447_v7 = vmax.f32 %v1433_v25, %v3030_v47  ;;  %v3123_v5 = vpop.f32.mrb[53].mxu1  ;;  %v1353_v47 = vrot.slane %v1352_v8, 1  ;;  %v3564_v40 = vld [vmem:[#allocation56_spill] sm:$0xff]  ;;  %v3138_v26 = vpop.f32.mrb[54].mxu0  ;;  %v3572_v63 = vld [vmem:[#allocation3_spill] sm:$0xff] }
 0x14a   :  { %v3113_v36 = vmax.f32 %v3563_v35, %v850_v9  ;;  %v1448_v59 = vmax.f32 %v1434_v34, %v3039_v0  ;;  %v3565_v9 = vmax.f32 %v2765_v12, %v3564_v40  ;;  %v1363_v51 = vadd.f32 %v1362_v48, %v1361_v42  ;;  %v3140_v12 = vpop.f32.mrb[54].mxu1  ;;  %v3144_v30 = vpop.f32.mrb[55].mxu0  ;;  %v3573_v25 = vld [vmem:[#allocation4_spill] sm:$0xff] }
 0x14b   :  { %v1449_v49 = vmax.f32 %v1435_v3, %v3043_v20  ;;  %v1460_v4 = vadd.f32 %v1446_v27, %v2318_v43  ;;  %v1461_v39 = vadd.f32 %v1447_v7, %v2318_v43  ;;  %v1382_v0 = vadd.f32 %v1381_v37, %v1380_v1  ;;  %v3566_v20 = vld [vmem:[#allocation12_spill] sm:$0xff]  ;;  %v3569_v43 = vld [vmem:[#allocation9_spill] sm:$0xff]  ;;  %v3146_v13 = vpop.f32.mrb[55].mxu1  ;;  %v3575_v3 = vld [vmem:[#allocation6_spill] sm:$0xff] }
 0x14c   :  { %v3131_v41 = vmax.f32 %v3565_v9, %v3049_v61  ;;  %v1462_v19 = vadd.f32 %v1448_v59, %v3566_v20  ;;  %v1354_v21 = vadd.f32 %v1353_v47, %v1352_v8  ;;  %v1364_v61 = vrot.slane %v1363_v51, 2  ;;  %v3574_v1 = vld [vmem:[#allocation5_spill] sm:$0xff]  ;;  %v3576_v27 = vld [vmem:[#allocation8_spill] sm:$0xff]  ;;  %v3578_v9 = vld [vmem:[#allocation15_spill] sm:$0xff] }
 0x14d   :  { %v1463_v53 = vadd.f32 %v1449_v49, %v3566_v20  ;;  %v1474_v54 = vmul.f32 %v1460_v4, %v3567_v45  ;;  %v1488_v38 = vmul.f32 %v1460_v4, %v3568_v17  ;;  %v1502_v14 = vmul.f32 %v1460_v4, %v3569_v43  ;;  %v3577_v59 = vld [vmem:[#allocation13_spill] sm:$0xff] }
 0x14e   :  { %v1383_v31 = vrot.slane %v1382_v0, 2  ;;  %v1516_v52 = vmul.f32 %v1460_v4, %v3570_v56  ;;  %v1530_v11 = vmul.f32 %v1460_v4, %v3571_v28  ;;  %v1407_v62 = vsel %vm1401_vm9, %v1354_v21, %v1406_v6  ;;  %v3580_v21 = vld [vmem:[#allocation19_spill] sm:$0xff]  ;;  %v3581_v45 = vld [vmem:[#allocation21_spill] sm:$0xff]  ;;  %v3582_v56 = vld [vmem:[#allocation14_spill] sm:$0xff] }
 0x14f   :  { %v1475_v18 = vmul.f32 %v1461_v39, %v3572_v63  ;;  %v1489_v42 = vmul.f32 %v1461_v39, %v3573_v25  ;;  %v1503_v16 = vmul.f32 %v1461_v39, %v3574_v1  ;;  %v1365_v34 = vadd.f32 %v1364_v61, %v1363_v51 }
 0x150   :  { %v1384_v46 = vadd.f32 %v1383_v31, %v1382_v0  ;;  %v1517_v8 = vmul.f32 %v1461_v39, %v3575_v3  ;;  %v1531_v7 = vmul.f32 %v1461_v39, %v3576_v27  ;;  %v1476_v6 = vmul.f32 %v1462_v19, %v3577_v59  ;;  %v3579_v0 = vld [vmem:[#allocation17_spill] sm:$0xff]  ;;  %v3583_v3 = vld [vmem:[#allocation16_spill] sm:$0xff]  ;;  %v3584_v27 = vld [vmem:[#allocation18_spill] sm:$0xff] }
 0x151   :  { %v1557_v35 = vsel %vm1238_vm4, %v1475_v18, 0.0  ;;  %v1589_v48 = vsel %vm1238_vm4, %v1489_v42, 0.0  ;;  %v1621_v37 = vsel %vm1238_vm4, %v1503_v16, 0.0  ;;  %v1366_v49 = vrot.slane %v1365_v34, 1  ;;  %v3586_v59 = vld [vmem:[#allocation22_spill] sm:$0xff] }
 0x152   :  { %v1385_v47 = vrot.slane %v1384_v46, 1  ;;  %v1653_v4 = vsel %vm1238_vm4, %v1517_v8, 0.0  ;;  %v1685_v40 = vsel %vm1238_vm4, %v1531_v7, 0.0  ;;  %v1490_v51 = vmul.f32 %v1462_v19, %v3578_v9 }
 0x153   :  { %v1504_v20 = vmul.f32 %v1462_v19, %v3579_v0  ;;  %v1518_v39 = vmul.f32 %v1462_v19, %v3580_v21  ;;  %v1532_v17 = vmul.f32 %v1462_v19, %v3581_v45  ;;  %v1367_v43 = vadd.f32 %v1366_v49, %v1365_v34  ;;  %v3587_v21 = vld [vmem:[#allocation63_spill] sm:$0xff] }
 0x154   :  { %v1386_v61 = vadd.f32 %v1385_v47, %v1384_v46  ;;  %v1544_v31 = vadd.f32 %v1476_v6, %v1474_v54  ;;  %v1477_v28 = vmul.f32 %v1463_v53, %v3582_v56  ;;  %v1576_v63 = vadd.f32 %v1490_v51, %v1488_v38  ;;  %v3585_v54 = vld [vmem:[#allocation20_spill] sm:$0xff] }
 0x155   :  { %v1608_v18 = vadd.f32 %v1504_v20, %v1502_v14  ;;  %v1640_v25 = vadd.f32 %v1518_v39, %v1516_v52  ;;  %v1672_v42 = vadd.f32 %v1532_v17, %v1530_v11  ;;  %v1404_v1 = vsel %vm1403_vm10, %v1367_v43, %v3090_v15  ;;  %v3588_v39 = vld [vmem:[#allocation64_spill] sm:$0xff]  ;;  %v3593_v43 = vld [vmem:[#allocation73_spill] sm:$0xff] }
 0x156   :  { %v1408_v16 = vsel %vm1403_vm10, %v1386_v61, %v1407_v62  ;;  %v1491_v8 = vmul.f32 %v1463_v53, %v3583_v3  ;;  %v1505_v7 = vmul.f32 %v1463_v53, %v3584_v27  ;;  %v1412_v19 = vsel %vm1411_vm11, %v1404_v1, 0.0  ;;  %v3602_v27 = vld [vmem:[#allocation85_spill] sm:$0xff] }
 0x157   :  { %v1414_v34 = vsel %vm1413_vm12, %v1408_v16, 0.0  ;;  %v1519_v46 = vmul.f32 %v1463_v53, %v3585_v54  ;;  %v1533_v38 = vmul.f32 %v1463_v53, %v3586_v59  ;;  %v1558_v52 = vsel %vm1238_vm4, %v1477_v28, 0.0  ;;  %v3600_v16 = vld [vmem:[#allocation84_spill] sm:$0xff] }
 0x158   :  { %v1415_v14 = vadd.f32 %v1414_v34, %v1412_v19  ;;  %v1590_v11 = vsel %vm1238_vm4, %v1491_v8, 0.0  ;;  %v1622_v15 = vsel %vm1238_vm4, %v1505_v7, 0.0  ;;  %v1559_v62 = vadd.f32 %v1558_v52, %v1557_v35  ;;  %v3603_v7 = vld [vmem:[#allocation86_spill] sm:$0xff] }
 0x159   :  { %v1591_v6 = vadd.f32 %v1590_v11, %v1589_v48  ;;  %v1623_v49 = vadd.f32 %v1622_v15, %v1621_v37  ;;  %v1654_v47 = vsel %vm1238_vm4, %v1519_v46, 0.0  ;;  %v1686_v51 = vsel %vm1238_vm4, %v1533_v38, 0.0  ;;  %v3590_v48 = vld [vmem:[#allocation68_spill] sm:$0xff]  ;;  %v3606_v46 = vld [vmem:[#allocation26_spill] sm:$0xff]  ;;  %v3610_v15 = vld [vmem:[#allocation25_spill] sm:$0xff] }
 0x15a   :  { %1416 = vadd.xlane.f32.xlu1 %v1415_v14  ;;  %v1655_v9 = vadd.f32 %v1654_v47, %v1653_v4  ;;  %v1450_v0 = vmax.f32 %v3113_v36, %v3047_v22  ;;  %v1451_v53 = vmax.f32 %v3131_v41, %v3051_v50  ;;  %v1687_v20 = vadd.f32 %v1686_v51, %v1685_v40  ;;  %v3592_v4 = vld [vmem:[#allocation72_spill] sm:$0xff]  ;;  %v3595_v22 = vld [vmem:[#allocation23_spill] sm:$0xff]  ;;  %v3596_v41 = vld [vmem:[#allocation77_spill] sm:$0xff] }
 0x15b   :  { %v3589_v45 = vmax.f32 %v3587_v21, %v3588_v39  ;;  %v3591_v37 = vmax.f32 %v2840_v57, %v3590_v48  ;;  %v3594_v61 = vmax.f32 %v3592_v4, %v3593_v43  ;;  %v3597_v40 = vld [vmem:[#allocation78_spill] sm:$0xff]  ;;  %v3604_v19 = vmax.f32 %v3602_v27, %v3603_v7  ;;  %v3607_v38 = vld [vmem:[#allocation28_spill] sm:$0xff]  ;;  %v3611_v47 = vld [vmem:[#allocation27_spill] sm:$0xff] }
 0x15c   :  { %v1464_v36 = vadd.f32 %v1450_v0, %v3595_v22  ;;  %v1465_v50 = vadd.f32 %v1451_v53, %v3595_v22  ;;  %v3598_v28 = vmax.f32 %v3596_v41, %v3597_v40  ;;  %v3609_v11 = vld [vmem:[#allocation32_spill] sm:$0xff]  ;;  %v3612_v51 = vld [vmem:[#allocation29_spill] sm:$0xff]  ;;  %v3615_v22 = vld [vmem:[#allocation34_spill] sm:$0xff] }
 0x15d   :  { %v1438_v35 = vmax.f32 %v3589_v45, %v3055_v44  ;;  %v1439_v17 = vmax.f32 %v3591_v37, %v3067_v29  ;;  %v1440_v56 = vmax.f32 %v3594_v61, %v3078_v33  ;;  %v3599_v44 = vld [vmem:[#allocation83_spill] sm:$0xff]  ;;  %v3216_v34 = vmax.f32 %v3604_v19, %v3121_v24  ;;  %v3614_v37 = vld [vmem:[#allocation33_spill] sm:$0xff]  ;;  %v3620_v7 = vld [vmem:[#allocation44_spill] sm:$0xff] }
 0x15e   :  { %v3201_v1 = vmax.f32 %v3598_v28, %v3085_v23  ;;  %v3601_v57 = vmax.f32 %v3599_v44, %v3600_v16  ;;  %v3605_v23 = vld [vmem:[#allocation24_spill] sm:$0xff]  ;;  %v1492_v59 = vmul.f32 %v1464_v36, %v3606_v46  ;;  %v1506_v14 = vmul.f32 %v1464_v36, %v3607_v38  ;;  %v3622_v38 = vld [vmem:[#allocation37_spill] sm:$0xff] }
 0x15f   :  { %v1452_v3 = vmax.f32 %v1438_v35, %v3057_v10  ;;  %v1453_v33 = vmax.f32 %v1439_v17, %v3069_v58  ;;  %v1454_v8 = vmax.f32 %v1440_v56, %v3080_v32  ;;  %v1478_v54 = vmul.f32 %v1464_v36, %v3605_v23  ;;  %v3613_v35 = vld [vmem:[#allocation31_spill] sm:$0xff]  ;;  %v3618_v16 = vld [vmem:[#allocation40_spill] sm:$0xff] }
 0x160   :  { %v3207_v29 = vmax.f32 %v3601_v57, %v3115_v2  ;;  %v3608_v2 = vld [vmem:[#allocation30_spill] sm:$0xff]  ;;  %v1534_v10 = vmul.f32 %v1464_v36, %v3609_v11  ;;  %v1479_v58 = vmul.f32 %v1465_v50, %v3610_v15  ;;  %v1493_v32 = vmul.f32 %v1465_v50, %v3611_v47  ;;  %v3621_v23 = vld [vmem:[#allocation35_spill] sm:$0xff]  ;;  %v3624_v11 = vld [vmem:[#allocation41_spill] sm:$0xff] }
 0x161   :  { %v1520_v52 = vmul.f32 %v1464_v36, %v3608_v2  ;;  %v1507_v0 = vmul.f32 %v1465_v50, %v3612_v51  ;;  %v1545_v53 = vadd.f32 %v1544_v31, %v1478_v54  ;;  %v1577_v21 = vadd.f32 %v1576_v63, %v1492_v59  ;;  %v3619_v57 = vld [vmem:[#allocation42_spill] sm:$0xff]  ;;  %v3623_v2 = vld [vmem:[#allocation39_spill] sm:$0xff]  ;;  %v3626_v47 = vld [vmem:[#allocation45_spill] sm:$0xff] }
 0x162   :  { %v1609_v24 = vadd.f32 %v1608_v18, %v1506_v14  ;;  %v1673_v45 = vadd.f32 %v1672_v42, %v1534_v10  ;;  %v1521_v48 = vmul.f32 %v1465_v50, %v3613_v35  ;;  %v1535_v17 = vmul.f32 %v1465_v50, %v3614_v37  ;;  %v3616_v42 = vld [vmem:[#allocation36_spill] sm:$0xff]  ;;  %v3617_v50 = vld [vmem:[#allocation38_spill] sm:$0xff]  ;;  %v3625_v15 = vld [vmem:[#allocation43_spill] sm:$0xff] }
 0x163   :  { %v1641_v39 = vadd.f32 %v1640_v25, %v1520_v52  ;;  %v1560_v4 = vsel %vm1238_vm4, %v1479_v58, 0.0  ;;  %v1592_v61 = vsel %vm1238_vm4, %v1493_v32, 0.0  ;;  %v1624_v56 = vsel %vm1238_vm4, %v1507_v0, 0.0  ;;  %v3627_v51 = vld [vmem:[#allocation46_spill] sm:$0xff]  ;;  %v3628_v0 = vld [vmem:[#allocation48_spill] sm:$0xff] }
 0x164   :  { %v1561_v43 = vadd.f32 %v1560_v4, %v1559_v62  ;;  %v1466_v36 = vadd.f32 %v1452_v3, %v3615_v22  ;;  %v1593_v41 = vadd.f32 %v1592_v61, %v1591_v6  ;;  %v1625_v40 = vadd.f32 %v1624_v56, %v1623_v49  ;;  %v3630_v61 = vld [vmem:[#allocation52_spill] sm:$0xff] }
 0x165   :  { %v1656_v31 = vsel %vm1238_vm4, %v1521_v48, 0.0  ;;  %v1688_v63 = vsel %vm1238_vm4, %v1535_v17, 0.0  ;;  %v1467_v3 = vadd.f32 %v1453_v33, %v3615_v22  ;;  %v1468_v54 = vadd.f32 %v1454_v8, %v3621_v23  ;;  %v3631_v22 = vld [vmem:[#allocation54_spill] sm:$0xff] }
 0x166   :  { %v1657_v18 = vadd.f32 %v1656_v31, %v1655_v9  ;;  %v1689_v25 = vadd.f32 %v1688_v63, %v1687_v20  ;;  %v1480_v28 = vmul.f32 %v1466_v36, %v3616_v42  ;;  %v1494_v44 = vmul.f32 %v1466_v36, %v3617_v50 }
 0x167   :  { %v1508_v62 = vmul.f32 %v1466_v36, %v3618_v16  ;;  %v1522_v27 = vmul.f32 %v1466_v36, %v3619_v57  ;;  %v1536_v19 = vmul.f32 %v1466_v36, %v3620_v7  ;;  %v1455_v9 = vmax.f32 %v3201_v1, %v3087_v60  ;;  %v3629_v60 = vld [vmem:[#allocation50_spill] sm:$0xff] }
 0x168   :  { %v1546_v6 = vadd.f32 %v1545_v53, %v1480_v28  ;;  %v1578_v49 = vadd.f32 %v1577_v21, %v1494_v44  ;;  %v1481_v14 = vmul.f32 %v1467_v3, %v3622_v38  ;;  %v1495_v52 = vmul.f32 %v1467_v3, %v3623_v2 }
 0x169   :  { %v1610_v20 = vadd.f32 %v1609_v24, %v1508_v62  ;;  %v1642_v46 = vadd.f32 %v1641_v39, %v1522_v27  ;;  %v1674_v59 = vadd.f32 %v1673_v45, %v1536_v19  ;;  %v1509_v10 = vmul.f32 %v1467_v3, %v3624_v11  ;;  %v3635_v62 = vld [vmem:[#allocation47_spill] sm:$0xff]  ;;  %v3636_v27 = vld [vmem:[#allocation49_spill] sm:$0xff] }
 0x16a   :  { %v1523_v58 = vmul.f32 %v1467_v3, %v3625_v15  ;;  %v1537_v33 = vmul.f32 %v1467_v3, %v3626_v47  ;;  %v1562_v32 = vsel %vm1238_vm4, %v1481_v14, 0.0  ;;  %v1482_v8 = vmul.f32 %v1468_v54, %v3627_v51  ;;  %v3637_v19 = vld [vmem:[#allocation51_spill] sm:$0xff]  ;;  %v3646_v51 = vld [vmem:[#allocation61_spill] sm:$0xff] }
 0x16b   :  { %v1496_v53 = vmul.f32 %v1468_v54, %v3628_v0  ;;  %v1510_v1 = vmul.f32 %v1468_v54, %v3629_v60  ;;  %v1563_v21 = vadd.f32 %v1562_v32, %v1561_v43  ;;  %v1594_v24 = vsel %vm1238_vm4, %v1495_v52, 0.0 }
 0x16c   :  { %v1626_v39 = vsel %vm1238_vm4, %v1509_v10, 0.0  ;;  %v1658_v45 = vsel %vm1238_vm4, %v1523_v58, 0.0  ;;  %v1595_v35 = vadd.f32 %v1594_v24, %v1593_v41  ;;  %v1690_v17 = vsel %vm1238_vm4, %v1537_v33, 0.0  ;;  %v3644_v58 = vld [vmem:[#allocation58_spill] sm:$0xff]  ;;  %v3645_v33 = vld [vmem:[#allocation60_spill] sm:$0xff] }
 0x16d   :  { %v1627_v48 = vadd.f32 %v1626_v39, %v1625_v40  ;;  %v1659_v37 = vadd.f32 %v1658_v45, %v1657_v18  ;;  %v1691_v4 = vadd.f32 %v1690_v17, %v1689_v25  ;;  %v1524_v56 = vmul.f32 %v1468_v54, %v3630_v61  ;;  %v3632_v40 = vld [vmem:[#allocation90_spill] sm:$0xff]  ;;  %v3633_v18 = vld [vmem:[#allocation91_spill] sm:$0xff]  ;;  %v3650_v39 = vld [vmem:[#allocation65_spill] sm:$0xff] }
 0x16e   :  { %v1538_v36 = vmul.f32 %v1468_v54, %v3631_v22  ;;  %v1547_v31 = vadd.f32 %v1546_v6, %v1482_v8  ;;  %v1579_v63 = vadd.f32 %v1578_v49, %v1496_v53  ;;  %v1611_v42 = vadd.f32 %v1610_v20, %v1510_v1  ;;  %v3638_v6 = vld [vmem:[#allocation53_spill] sm:$0xff]  ;;  %v3647_v8 = vld [vmem:[#allocation62_spill] sm:$0xff]  ;;  %v3648_v53 = vld [vmem:[#allocation87_spill] sm:$0xff] }
 0x16f   :  { %v1469_v43 = vadd.f32 %v1455_v9, %v3621_v23  ;;  %v1456_v28 = vmax.f32 %v3207_v29, %v3117_v55  ;;  %v1643_v50 = vadd.f32 %v1642_v46, %v1524_v56  ;;  %v1457_v41 = vmax.f32 %v3216_v34, %v3123_v5  ;;  %v3639_v23 = vld [vmem:[#allocation55_spill] sm:$0xff]  ;;  %v3640_v29 = vld [vmem:[#allocation57_spill] sm:$0xff]  ;;  %v3641_v5 = vld [vmem:[#allocation92_spill] sm:$0xff] }
 0x170   :  { %v1675_v44 = vadd.f32 %v1674_v59, %v1538_v36  ;;  %v3634_v25 = vmax.f32 %v3632_v40, %v3633_v18  ;;  %v3642_v34 = vld [vmem:[#allocation93_spill] sm:$0xff]  ;;  %v3649_v1 = vld [vmem:[#allocation59_spill] sm:$0xff] }
 0x171   :  { %v1483_v57 = vmul.f32 %v1469_v43, %v3635_v62  ;;  %v1497_v7 = vmul.f32 %v1469_v43, %v3636_v27  ;;  %v1511_v3 = vmul.f32 %v1469_v43, %v3637_v19  ;;  %v1525_v49 = vmul.f32 %v1469_v43, %v3638_v6  ;;  %v3652_v56 = vld [vmem:[#allocation67_spill] sm:$0xff]  ;;  %v3653_v36 = vld [vmem:[#allocation69_spill] sm:$0xff] }
 0x172   :  { %v1444_v16 = vmax.f32 %v3634_v25, %v3138_v26  ;;  %v1539_v55 = vmul.f32 %v1469_v43, %v3639_v23  ;;  %v1470_v54 = vadd.f32 %v1456_v28, %v3640_v29  ;;  %v1471_v9 = vadd.f32 %v1457_v41, %v3640_v29 }
 0x173   :  { %v3643_v20 = vmax.f32 %v3641_v5, %v3642_v34  ;;  %v1564_v26 = vsel %vm1238_vm4, %v1483_v57, 0.0  ;;  %v1596_v59 = vsel %vm1238_vm4, %v1497_v7, 0.0  ;;  %v1628_v38 = vsel %vm1238_vm4, %v1511_v3, 0.0  ;;  %v3654_v57 = vld [vmem:[#allocation70_spill] sm:$0xff] }
 0x174   :  { %v1660_v14 = vsel %vm1238_vm4, %v1525_v49, 0.0  ;;  %v1565_v2 = vadd.f32 %v1564_v26, %v1563_v21  ;;  %v1597_v52 = vadd.f32 %v1596_v59, %v1595_v35  ;;  %v1629_v11 = vadd.f32 %v1628_v38, %v1627_v48  ;;  %v3655_v49 = vld [vmem:[#allocation71_spill] sm:$0xff] }
 0x175   :  { %v1445_v46 = vmax.f32 %v3643_v20, %v3144_v30  ;;  %v1661_v10 = vadd.f32 %v1660_v14, %v1659_v37  ;;  %v1692_v15 = vsel %vm1238_vm4, %v1539_v55, 0.0  ;;  %v1484_v47 = vmul.f32 %v1470_v54, %v3644_v58  ;;  %v3651_v37 = vld [vmem:[#allocation66_spill] sm:$0xff]  ;;  %v3657_v55 = vld [vmem:[#allocation76_spill] sm:$0xff] }
 0x176   :  { %v1498_v32 = vmul.f32 %v1470_v54, %v3645_v33  ;;  %v1512_v30 = vmul.f32 %v1470_v54, %v3646_v51  ;;  %v1526_v0 = vmul.f32 %v1470_v54, %v3647_v8  ;;  %v1540_v60 = vmul.f32 %v1470_v54, %v3648_v53  ;;  %v3658_v54 = vld [vmem:[#allocation79_spill] sm:$0xff] }
 0x177   :  { %v1485_v24 = vmul.f32 %v1471_v9, %v3649_v1  ;;  %v1499_v45 = vmul.f32 %v1471_v9, %v3650_v39  ;;  %v1548_v21 = vadd.f32 %v1547_v31, %v1484_v47  ;;  %v1513_v17 = vmul.f32 %v1471_v9, %v3651_v37  ;;  %v3664_v47 = vld [vmem:[#allocation89_spill] sm:$0xff] }
 0x178   :  { %v1580_v35 = vadd.f32 %v1579_v63, %v1498_v32  ;;  %v1612_v48 = vadd.f32 %v1611_v42, %v1512_v30  ;;  %v1644_v61 = vadd.f32 %v1643_v50, %v1526_v0  ;;  %v1527_v22 = vmul.f32 %v1471_v9, %v3652_v56 }
 0x179   :  { %v1541_v43 = vmul.f32 %v1471_v9, %v3653_v36  ;;  %v1566_v28 = vsel %vm1238_vm4, %v1485_v24, 0.0  ;;  %v1598_v40 = vsel %vm1238_vm4, %v1499_v45, 0.0  ;;  %v1630_v18 = vsel %vm1238_vm4, %v1513_v17, 0.0  ;;  %v3659_v9 = vld [vmem:[#allocation88_spill] sm:$0xff] }
 0x17a   :  { %v1567_v41 = vadd.f32 %v1566_v28, %v1565_v2  ;;  %v1458_v25 = vmax.f32 %v1444_v16, %v3140_v12  ;;  %v1599_v62 = vadd.f32 %v1598_v40, %v1597_v52  ;;  %v1631_v31 = vadd.f32 %v1630_v18, %v1629_v11  ;;  %v3656_v16 = vld [vmem:[#allocation75_spill] sm:$0xff] }
 0x17b   :  { %v1662_v63 = vsel %vm1238_vm4, %v1527_v22, 0.0  ;;  %v1459_v42 = vmax.f32 %v1445_v46, %v3146_v13  ;;  %v3300_v7 = vadd.f32 %v1675_v44, %v1540_v60  ;;  %v3302_v19 = vadd.f32 %v1692_v15, %v1691_v4  ;;  %v3660_v44 = vld [vmem:[#allocation74_spill] sm:$0xff]  ;;  %v3661_v4 = vld [vmem:[#allocation80_spill] sm:$0xff]  ;;  %v3662_v46 = vld [vmem:[#allocation81_spill] sm:$0xff] }
 0x17c   :  { %v1663_v50 = vadd.f32 %v1662_v63, %v1661_v10  ;;  %v1472_v27 = vadd.f32 %v1458_v25, %v3654_v57  ;;  %v3306_v6 = vsel %vm1238_vm4, %v1541_v43, 0.0  ;;  %v3663_v15 = vld [vmem:[#allocation82_spill] sm:$0xff] }
 0x17d   :  { %v1473_v3 = vadd.f32 %v1459_v42, %v3654_v57 }
 0x17e   :  { %v1486_v12 = vmul.f32 %v1472_v27, %v3655_v49  ;;  %v1500_v23 = vmul.f32 %v1472_v27, %v3656_v16  ;;  %v1514_v29 = vmul.f32 %v1472_v27, %v3657_v55  ;;  %v1528_v13 = vmul.f32 %v1472_v27, %v3658_v54 }
 0x17f   :  { %v3313_v5 = vmul.f32 %v1472_v27, %v3659_v9  ;;  %v1487_v34 = vmul.f32 %v1473_v3, %v3660_v44  ;;  %v1501_v20 = vmul.f32 %v1473_v3, %v3661_v4  ;;  %v1515_v26 = vmul.f32 %v1473_v3, %v3662_v46 }
 0x180   :  { %v1549_v59 = vsel %vm1229_vm5, %v1486_v12, 0.0  ;;  %v1581_v38 = vsel %vm1229_vm5, %v1500_v23, 0.0  ;;  %v1613_v14 = vsel %vm1229_vm5, %v1514_v29, 0.0  ;;  %v1645_v2 = vsel %vm1229_vm5, %v1528_v13, 0.0 }
 0x181   :  { %v1550_v52 = vadd.f32 %v1549_v59, %v1548_v21  ;;  %v1582_v11 = vadd.f32 %v1581_v38, %v1580_v35  ;;  %v1614_v10 = vadd.f32 %v1613_v14, %v1612_v48  ;;  %v1529_v58 = vmul.f32 %v1473_v3, %v3663_v15 }
 0x182   :  { %v1543_v33 = vmul.f32 %v1473_v3, %v3664_v47  ;;  %v1568_v32 = vsel %vm1250_vm6, %v1487_v34, 0.0  ;;  %v1600_v51 = vsel %vm1250_vm6, %v1501_v20, 0.0  ;;  %v1632_v30 = vsel %vm1250_vm6, %v1515_v26, 0.0 }
 0x183   :  { %v1551_v8 = vrot.slane %v1550_v52, 4  ;;  %v1583_v0 = vrot.slane %v1582_v11, 4  ;;  %v1569_v53 = vadd.f32 %v1568_v32, %v1567_v41  ;;  %v1601_v60 = vadd.f32 %v1600_v51, %v1599_v62 }
 0x184   :  { %v1633_v1 = vadd.f32 %v1632_v30, %v1631_v31  ;;  %v1664_v24 = vsel %vm1250_vm6, %v1529_v58, 0.0  ;;  %v1615_v39 = vrot.slane %v1614_v10, 4  ;;  %v1646_v45 = vadd.f32 %v1645_v2, %v1644_v61 }
 0x185   :  { %v1570_v21 = vrot.slane %v1569_v53, 4  ;;  %v1602_v35 = vrot.slane %v1601_v60, 4  ;;  %v1552_v48 = vadd.f32 %v1551_v8, %v1550_v52  ;;  %v1584_v37 = vadd.f32 %v1583_v0, %v1582_v11 }
 0x186   :  { %v1616_v17 = vadd.f32 %v1615_v39, %v1614_v10  ;;  %v1634_v56 = vrot.slane %v1633_v1, 4  ;;  %v1647_v22 = vrot.slane %v1646_v45, 4  ;;  %v1665_v36 = vadd.f32 %v1664_v24, %v1663_v50 }
 0x187   :  { %v1553_v43 = vrot.slane %v1552_v48, 2  ;;  %v1571_v28 = vadd.f32 %v1570_v21, %v1569_v53  ;;  %v1585_v40 = vrot.slane %v1584_v37, 2  ;;  %v1603_v18 = vadd.f32 %v1602_v35, %v1601_v60 }
 0x188   :  { %v1617_v25 = vrot.slane %v1616_v17, 2  ;;  %v1635_v41 = vadd.f32 %v1634_v56, %v1633_v1  ;;  %v1648_v62 = vadd.f32 %v1647_v22, %v1646_v45  ;;  %v1666_v31 = vrot.slane %v1665_v36, 4 }
 0x189   :  { %v1554_v63 = vadd.f32 %v1553_v43, %v1552_v48  ;;  %v1572_v42 = vrot.slane %v1571_v28, 2  ;;  %v1586_v57 = vadd.f32 %v1585_v40, %v1584_v37  ;;  %v1604_v61 = vrot.slane %v1603_v18, 2  ;;  %v1731_v40 = vld [vmem:[%s3354_s4] sm:$0x1f] }
 0x18a   :  { %v1618_v27 = vadd.f32 %v1617_v25, %v1616_v17  ;;  %v1636_v3 = vrot.slane %v1635_v41, 2  ;;  %v1649_v49 = vrot.slane %v1648_v62, 2  ;;  %v1667_v12 = vadd.f32 %v1666_v31, %v1665_v36 }
 0x18b   :  { %v1555_v16 = vrot.slane %v1554_v63, 1  ;;  %v1573_v23 = vadd.f32 %v1572_v42, %v1571_v28  ;;  %v1587_v55 = vrot.slane %v1586_v57, 1  ;;  %v1605_v50 = vadd.f32 %v1604_v61, %v1603_v18 }
 0x18c   :  { %v1619_v29 = vrot.slane %v1618_v27, 1  ;;  %v1637_v54 = vadd.f32 %v1636_v3, %v1635_v41  ;;  %v1650_v13 = vadd.f32 %v1649_v49, %v1648_v62  ;;  %v1668_v9 = vrot.slane %v1667_v12, 2 }
 0x18d   :  { %v1556_v44 = vadd.f32 %v1555_v16, %v1554_v63  ;;  %v1574_v34 = vrot.slane %v1573_v23, 1  ;;  %v1588_v4 = vadd.f32 %v1587_v55, %v1586_v57  ;;  %v1606_v20 = vrot.slane %v1605_v50, 1 }
 0x18e   :  { %v1620_v46 = vadd.f32 %v1619_v29, %v1618_v27  ;;  %v1638_v26 = vrot.slane %v1637_v54, 1  ;;  %v1651_v59 = vrot.slane %v1650_v13, 1  ;;  %v1669_v38 = vadd.f32 %v1668_v9, %v1667_v12 }
 0x18f   :  { %v1575_v14 = vadd.f32 %v1574_v34, %v1573_v23  ;;  %v1607_v2 = vadd.f32 %v1606_v20, %v1605_v50  ;;  %v1677_v52 = vsel %vm1229_vm5, %v3313_v5, 0.0  ;;  %v1695_v11 = vadd.f32 %v3306_v6, %v3302_v19 }
 0x190   :  { %v1639_v10 = vadd.f32 %v1638_v26, %v1637_v54  ;;  %v1670_v15 = vrot.slane %v1669_v38, 1  ;;  %v1678_v58 = vadd.f32 %v1677_v52, %v3300_v7  ;;  %v1652_v47 = vadd.f32 %v1651_v59, %v1650_v13 }
 0x191   :  { %v1696_v32 = vsel %vm1250_vm6, %v1543_v33, 0.0  ;;  %v1714_v51 = vsel %vm1397_vm7, %v1588_v4, %v1556_v44  ;;  %v1718_v30 = vsel %vm1397_vm7, %v1607_v2, %v1575_v14 }
 0x192   :  { %v1671_v8 = vadd.f32 %v1670_v15, %v1669_v38  ;;  %v1679_v0 = vrot.slane %v1678_v58, 4  ;;  %v1697_v53 = vadd.f32 %v1696_v32, %v1695_v11  ;;  %v1715_v60 = vsel %vm1399_vm8, %v1620_v46, %v1714_v51 }
 0x193   :  { %v1716_v5 = vsel %vm1401_vm9, %v1652_v47, %v1715_v60  ;;  %v1719_v19 = vsel %vm1399_vm8, %v1639_v10, %v1718_v30 }
 0x194   :  { %v1680_v6 = vadd.f32 %v1679_v0, %v1678_v58  ;;  %v1698_v1 = vrot.slane %v1697_v53, 4  ;;  %v1720_v7 = vsel %vm1401_vm9, %v1671_v8, %v1719_v19 }
 0x196   :  { %v1681_v24 = vrot.slane %v1680_v6, 2  ;;  %v1699_v39 = vadd.f32 %v1698_v1, %v1697_v53 }
 0x198   :  { %v1682_v33 = vadd.f32 %v1681_v24, %v1680_v6  ;;  %v1700_v45 = vrot.slane %v1699_v39, 2 }
 0x19a   :  { %v1683_v21 = vrot.slane %v1682_v33, 1  ;;  %v1701_v35 = vadd.f32 %v1700_v45, %v1699_v39 }
 0x19c   :  { %v1684_v48 = vadd.f32 %v1683_v21, %v1682_v33  ;;  %v1702_v37 = vrot.slane %v1701_v35, 1 }
 0x19e   :  { %v1703_v17 = vadd.f32 %v1702_v37, %v1701_v35  ;;  %v1717_v56 = vsel %vm1403_vm10, %v1684_v48, %v1716_v5 }
 0x19f   :  { %v1724_v22 = vsel %vm1411_vm11, %v1717_v56, 0.0 }
 0x1a0   :  { %v1721_v36 = vsel %vm1403_vm10, %v1703_v17, %v1720_v7 }
 0x1a1   :  { %v1725_v43 = vsel %vm1413_vm12, %v1721_v36, 0.0 }
 0x1a2   :  { %v1726_v28 = vadd.f32 %v1725_v43, %v1724_v22 }
 0x1a4   :  { %1727 = vadd.xlane.f32.xlu0 %v1726_v28 }
 0x1ba   :  { %1734 = vperm.xlu0 %1867, %v1731_v40  }
 0x1e7   :  { %v1417_v25 = vpop.xlane.xlu1 %1416 }
 0x231   :  { %v1728_v18 = vpop.xlane.xlu0 %1727 }
 0x232   :  { %v1730_v41 = vsel %vm1729_vm13, %v1417_v25, %v1728_v18 }
 0x239   :  { %v1735_v62 = vpop.permute.xlu0 %1734 }
 0x23a   :  { %v1737_v31 = vadd.f32 %v1735_v62, %v1730_v41 }
 0x23c   :  { %1739 = vst.msk [vmem:[%s3355_s5] sm:$0x1f] %vm1738_vm14, %v1737_v31 }

</bundles_post_ra>
